<compile_context>
chip_gen: v6e
topology: v6e:2x2x1
jax: 0.10.0
libtpu: 0.0.40
codegen_flags: <defaults>
</compile_context>

<pallas_src>
import jax
import jax.numpy as jnp
from jax.experimental import pallas as pl
from jax.experimental.pallas import tpu as pltpu

MAX_LEN_DOC = 110
MAX_LEN_QUERY = 100
VOCAB = 128
DIM = 32                       # hidden dim
N_HEADS = 4
N_LAYERS = 2
FFN = 4 * DIM                  # 128
MAX_LEN = MAX_LEN_QUERY + MAX_LEN_DOC   # 210
LN_EPS = 1e-5
HEAD_DIM = DIM // N_HEADS      # 8
LANES = 128


# --------------------- packed parameter slab layout ([SLAB_ROWS, 128] f32) ---------------------

def _round8(n):
    return (n + 7) // 8 * 8


TOK_OFF = 0                                    # tok_emb   [VOCAB, DIM]
POS_OFF = TOK_OFF + VOCAB                      # pos_emb   [MAX_LEN, DIM]
HEAD_W_OFF = POS_OFF + _round8(MAX_LEN)        # head_w    [DIM, VOCAB]
HEAD_B_OFF = HEAD_W_OFF + DIM                  # head_b    [VOCAB]
LAYER_OFF = HEAD_B_OFF + 8
# per-layer relative row offsets
WQ_R, WK_R, WV_R, WO_R = 0, DIM, 2 * DIM, 3 * DIM
W1_R = 4 * DIM                                 # [DIM, FFN]
W2_R = W1_R + DIM                              # [FFN, DIM]
VEC_R = W2_R + FFN                             # one row per small vector below
BQ_R, BK_R, BV_R, BO_R = VEC_R + 0, VEC_R + 1, VEC_R + 2, VEC_R + 3
LN1G_R, LN1B_R = VEC_R + 4, VEC_R + 5
B1_R, B2_R = VEC_R + 6, VEC_R + 7
LN2G_R, LN2B_R = VEC_R + 8, VEC_R + 9
LAYER_ROWS = _round8(VEC_R + 10)               # 304
SLAB_ROWS = LAYER_OFF + N_LAYERS * LAYER_ROWS  # 992


# ----------------------------- math helpers (pure jnp) -----------------------------

def _layer_norm(x, g, b):
    # PyTorch nn.LayerNorm: biased variance over last dim, eps=1e-5.
    mean = jnp.mean(x, axis=-1, keepdims=True)
    xc = x - mean
    var = jnp.mean(xc * xc, axis=-1, keepdims=True)
    return xc * jax.lax.rsqrt(var + LN_EPS) * g + b


def _gelu_exact(x):
    # PyTorch F.gelu default (activation='gelu'): exact erf-based gelu.
    return 0.5 * x * (1.0 + jax.lax.erf(x * 0.7071067811865476))


# ------------------------------- fused forward kernel -------------------------------

def make_fwd_kernel(s):
    """Kernel for one batch item with static sequence length s."""
    scale = 1.0 / float(HEAD_DIM) ** 0.5

    def fwd_kernel(x_ref, p_ref, logits_ref, hidden_ref):
        # x_ref: [s, 1] int32 (batch dim squeezed by BlockSpec)
        # p_ref: [SLAB_ROWS, 128] f32 packed parameter slab (resident, DMA'd once)
        # logits_ref: [s, VOCAB] f32 ; hidden_ref: [s, 128] f32 (lane-dense)

        # --- embeddings: token gather as one-hot MXU matmul + in-kernel positional add ---
        ids = x_ref[...]                                              # [s, 1]
        vocab_iota = jax.lax.broadcasted_iota(jnp.int32, (s, VOCAB), 1)
        onehot = (ids == vocab_iota).astype(jnp.float32)              # [s, VOCAB]
        tok = p_ref[TOK_OFF:TOK_OFF + VOCAB, 0:DIM]                   # [VOCAB, DIM]
        pos = p_ref[POS_OFF:POS_OFF + s, 0:DIM]                       # [s, DIM]
        h = jnp.dot(onehot, tok, preferred_element_type=jnp.float32) + pos

        # --- head-selector lane masks (hoisted: identical for every layer) ---
        lane = jax.lax.broadcasted_iota(jnp.int32, (1, DIM), 1)
        head_masks = [
            ((lane >= hd * HEAD_DIM) & (lane < (hd + 1) * HEAD_DIM)).astype(jnp.float32)
            for hd in range(N_HEADS)
        ]

        # --- encoder layers (post-norm; dropout == identity in eval forward) ---
        for li in range(N_LAYERS):
            base = LAYER_OFF + li * LAYER_ROWS
            wq = p_ref[base + WQ_R:base + WQ_R + DIM, 0:DIM]
            wk = p_ref[base + WK_R:base + WK_R + DIM, 0:DIM]
            wv = p_ref[base + WV_R:base + WV_R + DIM, 0:DIM]
            wo = p_ref[base + WO_R:base + WO_R + DIM, 0:DIM]
            w1 = p_ref[base + W1_R:base + W1_R + DIM, 0:FFN]
            w2 = p_ref[base + W2_R:base + W2_R + FFN, 0:DIM]
            bq = p_ref[base + BQ_R:base + BQ_R + 1, 0:DIM]
            bk = p_ref[base + BK_R:base + BK_R + 1, 0:DIM]
            bv = p_ref[base + BV_R:base + BV_R + 1, 0:DIM]
            bo = p_ref[base + BO_R:base + BO_R + 1, 0:DIM]
            ln1_g = p_ref[base + LN1G_R:base + LN1G_R + 1, 0:DIM]
            ln1_b = p_ref[base + LN1B_R:base + LN1B_R + 1, 0:DIM]
            b1 = p_ref[base + B1_R:base + B1_R + 1, 0:FFN]
            b2 = p_ref[base + B2_R:base + B2_R + 1, 0:DIM]
            ln2_g = p_ref[base + LN2G_R:base + LN2G_R + 1, 0:DIM]
            ln2_b = p_ref[base + LN2B_R:base + LN2B_R + 1, 0:DIM]

            q = jnp.dot(h, wq, preferred_element_type=jnp.float32) + bq   # [s, DIM]
            k = jnp.dot(h, wk, preferred_element_type=jnp.float32) + bk
            v = jnp.dot(h, wv, preferred_element_type=jnp.float32) + bv
            q = q * scale        # fold 1/sqrt(head_dim) into q (s/dh fewer multiplies)

            # per-head attention via full-width masked contractions:
            # (q*m_h) zeroes every non-head-h feature, so contracting over the full
            # DIM axis yields exactly head h's scores; P_h @ (v*m_h) places head h's
            # context in its own output columns. No dh=8 lane slices anywhere.
            attn = jnp.zeros((s, DIM), jnp.float32)
            for hd in range(N_HEADS):
                m = head_masks[hd]
                sc = jax.lax.dot_general(q * m, k, (((1,), (1,)), ((), ())),
                                         preferred_element_type=jnp.float32)   # [s, s]
                sc = sc - jnp.max(sc, axis=-1, keepdims=True)
                prob = jnp.exp(sc)
                prob = prob * pl.reciprocal(jnp.sum(prob, axis=-1, keepdims=True),
                                            approx=True)
                attn = attn + jnp.dot(prob, v * m,
                                      preferred_element_type=jnp.float32)       # [s, DIM]

            attn = jnp.dot(attn, wo, preferred_element_type=jnp.float32) + bo
            h = _layer_norm(h + attn, ln1_g, ln1_b)

            f = jnp.dot(h, w1, preferred_element_type=jnp.float32) + b1          # [s, FFN]
            f = _gelu_exact(f)
            f = jnp.dot(f, w2, preferred_element_type=jnp.float32) + b2          # [s, DIM]
            h = _layer_norm(h + f, ln2_g, ln2_b)

        # --- outputs (both lane-dense: last dim = 128) ---
        head_w = p_ref[HEAD_W_OFF:HEAD_W_OFF + DIM, :]                # [DIM, VOCAB]
        head_b = p_ref[HEAD_B_OFF:HEAD_B_OFF + 1, :]                  # [1, VOCAB]
        logits_ref[...] = jnp.dot(h, head_w,
                                  preferred_element_type=jnp.float32) + head_b
        hidden_ref[...] = jnp.concatenate(
            [h, jnp.zeros((s, LANES - DIM), jnp.float32)], axis=1)

    return fwd_kernel


# ----------------------------------- wrapper -----------------------------------

def forward(slab, x):
    """slab: packed [SLAB_ROWS,128] params; x: int32 [N, S] token ids.
    Returns (logits [N,S,VOCAB], hidden [N,S,DIM])."""
    N_, S_ = x.shape
    x3 = x.reshape(N_, S_, 1).astype(jnp.int32)

    logits, hidden_pad = pl.pallas_call(
        make_fwd_kernel(S_),
        out_shape=(jax.ShapeDtypeStruct((N_, S_, VOCAB), jnp.float32),
                   jax.ShapeDtypeStruct((N_, S_, LANES), jnp.float32)),
        grid=(N_,),
        in_specs=[pl.BlockSpec((None, S_, 1), lambda b: (b, 0, 0)),
                  pl.BlockSpec((SLAB_ROWS, LANES), lambda b: (0, 0))],
        out_specs=(pl.BlockSpec((None, S_, VOCAB), lambda b: (b, 0, 0)),
                   pl.BlockSpec((None, S_, LANES), lambda b: (b, 0, 0))),
        compiler_params=pltpu.CompilerParams(
            dimension_semantics=("parallel",),         # megacore batch sharding on v7x
            vmem_limit_bytes=32 * 1024 * 1024),
    )(x3, slab)

    return logits, hidden_pad[:, :, :DIM]


forward_jit = jax.jit(forward)


# ------------------------------ parameter packing ------------------------------

def pack_params(params):
    """Pack all weights/biases into one lane-dense [SLAB_ROWS, 128] f32 slab (run once)."""
    slab = jnp.zeros((SLAB_ROWS, LANES), jnp.float32)

    def put(sl, row, arr):
        arr = jnp.asarray(arr, jnp.float32)
        if arr.ndim == 1:
            arr = arr[None, :]
        return sl.at[row:row + arr.shape[0], 0:arr.shape[1]].set(arr)

    slab = put(slab, TOK_OFF, params["tok_emb"])
    slab = put(slab, POS_OFF, params["pos_emb"])
    slab = put(slab, HEAD_W_OFF, params["head_w"])
    slab = put(slab, HEAD_B_OFF, params["head_b"])
    for li, layer in enumerate(params["layers"]):
        base = LAYER_OFF + li * LAYER_ROWS
        slab = put(slab, base + WQ_R, layer["wq"])
        slab = put(slab, base + WK_R, layer["wk"])
        slab = put(slab, base + WV_R, layer["wv"])
        slab = put(slab, base + WO_R, layer["wo"])
        slab = put(slab, base + W1_R, layer["w1"])
        slab = put(slab, base + W2_R, layer["w2"])
        slab = put(slab, base + BQ_R, layer["bq"])
        slab = put(slab, base + BK_R, layer["bk"])
        slab = put(slab, base + BV_R, layer["bv"])
        slab = put(slab, base + BO_R, layer["bo"])
        slab = put(slab, base + LN1G_R, layer["ln1_g"])
        slab = put(slab, base + LN1B_R, layer["ln1_b"])
        slab = put(slab, base + B1_R, layer["b1"])
        slab = put(slab, base + B2_R, layer["b2"])
        slab = put(slab, base + LN2G_R, layer["ln2_g"])
        slab = put(slab, base + LN2B_R, layer["ln2_b"])
    return slab


# ----------------------------- pure-JAX reference -----------------------------

def forward_ref(params, x):
    N_, S_ = x.shape
    scale = 1.0 / float(HEAD_DIM) ** 0.5
    h = params["tok_emb"][x] + params["pos_emb"][:S_][None]
    for layer in params["layers"]:
        q = h @ layer["wq"] + layer["bq"]
        k = h @ layer["wk"] + layer["bk"]
        v = h @ layer["wv"] + layer["bv"]

        def heads(t):
            return t.reshape(N_, S_, N_HEADS, HEAD_DIM).transpose(0, 2, 1, 3)

        qh, kh, vh = heads(q), heads(k), heads(v)
        sc = jnp.einsum('nhqd,nhkd->nhqk', qh, kh) * scale
        p = jax.nn.softmax(sc, axis=-1)
        o = jnp.einsum('nhqk,nhkd->nhqd', p, vh)
        attn = o.transpose(0, 2, 1, 3).reshape(N_, S_, DIM)
        attn = attn @ layer["wo"] + layer["bo"]
        h = _layer_norm(h + attn, layer["ln1_g"], layer["ln1_b"])
        f = h @ layer["w1"] + layer["b1"]
        f = _gelu_exact(f)
        f = f @ layer["w2"] + layer["b2"]
        h = _layer_norm(h + f, layer["ln2_g"], layer["ln2_b"])
    logits = h @ params["head_w"] + params["head_b"]
    return logits, h


# ------------------------------ parameter init ------------------------------

def init_params(key):
    def normal(k, shape, scale_=0.02):
        return scale_ * jax.random.normal(k, shape, dtype=jnp.float32)

    keys = iter(jax.random.split(key, 4 + 12 * N_LAYERS))
    params = {
        "tok_emb": normal(next(keys), (VOCAB, DIM)),
        "pos_emb": normal(next(keys), (MAX_LEN, DIM)),
        "head_w": normal(next(keys), (DIM, VOCAB)),
        "head_b": normal(next(keys), (VOCAB,)),
        "layers": [],
    }
    for _ in range(N_LAYERS):
        params["layers"].append({
            "wq": normal(next(keys), (DIM, DIM)),
            "wk": normal(next(keys), (DIM, DIM)),
            "wv": normal(next(keys), (DIM, DIM)),
            "wo": normal(next(keys), (DIM, DIM)),
            "w1": normal(next(keys), (DIM, FFN)),
            "w2": normal(next(keys), (FFN, DIM)),
            "bq": normal(next(keys), (DIM,)),
            "bk": normal(next(keys), (DIM,)),
            "bv": normal(next(keys), (DIM,)),
            "bo": normal(next(keys), (DIM,)),
            "b1": normal(next(keys), (FFN,)),
            "b2": normal(next(keys), (DIM,)),
            "ln1_g": jnp.ones((DIM,), jnp.float32),
            "ln1_b": jnp.zeros((DIM,), jnp.float32),
            "ln2_g": jnp.ones((DIM,), jnp.float32),
            "ln2_b": jnp.zeros((DIM,), jnp.float32),
        })
    return params


# ----------------------------------- main ------------------------------------

if __name__ == "__main__":
    key = jax.random.PRNGKey(0)
    pkey, xkey = jax.random.split(key)
    params = init_params(pkey)
    slab = pack_params(params)          # one-time packing, outside the jitted forward

    N, S = 2, 8
    x = jax.random.randint(xkey, (N, S), 0, VOCAB, dtype=jnp.int32)

    logits, hidden = forward_jit(slab, x)
    jax.block_until_ready(logits)
    jax.block_until_ready(hidden)

    assert logits.shape == (N, S, VOCAB)
    assert hidden.shape == (N, S, DIM)

    # numerical self-check against a pure-JAX reference (approx reciprocal in the
    # softmax denominator is the only intentional deviation; tolerance is generous).
    ref_logits, ref_hidden = forward_ref(params, x)
    assert jnp.allclose(logits, ref_logits, atol=1e-2, rtol=1e-2), \
        float(jnp.max(jnp.abs(logits - ref_logits)))
    assert jnp.allclose(hidden, ref_hidden, atol=1e-2, rtol=1e-2), \
        float(jnp.max(jnp.abs(hidden - ref_hidden)))

    print("KERNEL_OK")
</pallas_src>

<mosaic_0001>
module attributes {stable_mosaic.version = 11 : i64} {
  func.func @fwd_kernel(%arg0: i32, %arg1: memref<1x8x1xi32, #tpu.memory_space<vmem>>, %arg2: memref<992x128xf32, #tpu.memory_space<vmem>>, %arg3: memref<1x8x128xf32, #tpu.memory_space<vmem>>, %arg4: memref<1x8x128xf32, #tpu.memory_space<vmem>>) attributes {dimension_semantics = [#tpu.dimension_semantics<parallel>], iteration_bounds = array<i64: 2>, scalar_prefetch = 0 : i64, scratch_operands = 0 : i64, tpu.core_type = #tpu.core_type<tc>, window_params = [{transform_indices = @transform_0, window_bounds = array<i64: 1, 8, 1>}, {pipeline_mode = #tpu.pipeline_mode<synchronous>, transform_indices = @transform_1, window_bounds = array<i64: 992, 128>}, {transform_indices = @transform_2, window_bounds = array<i64: 1, 8, 128>}, {transform_indices = @transform_3, window_bounds = array<i64: 1, 8, 128>}]} {
    %c0 = arith.constant 0 : index
    %c0_0 = arith.constant 0 : index
    %c0_1 = arith.constant 0 : index
    %0 = vector.load %arg1[%c0, %c0_0, %c0_1] : memref<1x8x1xi32, #tpu.memory_space<vmem>>, vector<1x8x1xi32>
    %1 = vector.shape_cast %0 : vector<1x8x1xi32> to vector<8x1xi32>
    %2 = tpu.iota {dimensions = array<i32: 1>} : vector<8x128xi32>
    %3 = vector.broadcast %1 : vector<8x1xi32> to vector<8x128xi32>
    %4 = arith.cmpi eq, %3, %2 : vector<8x128xi32>
    %5 = arith.extui %4 : vector<8x128xi1> to vector<8x128xi32>
    %6 = arith.sitofp %5 : vector<8x128xi32> to vector<8x128xf32>
    %c0_2 = arith.constant 0 : index
    %c0_3 = arith.constant 0 : index
    %7 = vector.load %arg2[%c0_2, %c0_3] : memref<992x128xf32, #tpu.memory_space<vmem>>, vector<128x32xf32>
    %c128 = arith.constant 128 : index
    %c0_4 = arith.constant 0 : index
    %8 = vector.load %arg2[%c128, %c0_4] : memref<992x128xf32, #tpu.memory_space<vmem>>, vector<8x32xf32>
    %cst = arith.constant dense<0.000000e+00> : vector<8x32xf32>
    %9 = tpu.matmul %6, %7, %cst {dimension_numbers = #tpu.dot_dimension_numbers<[1], [0], [0], [1], [0, 0, 1, 1], [], []>} : vector<8x128xf32>, vector<128x32xf32>, vector<8x32xf32> -> vector<8x32xf32>
    %10 = arith.addf %9, %8 : vector<8x32xf32>
    %11 = tpu.iota {dimensions = array<i32: 1>} : vector<1x32xi32>
    %c0_i32 = arith.constant 0 : i32
    %12 = vector.broadcast %c0_i32 : i32 to vector<1x32xi32>
    %13 = arith.cmpi sge, %11, %12 : vector<1x32xi32>
    %c8_i32 = arith.constant 8 : i32
    %14 = vector.broadcast %c8_i32 : i32 to vector<1x32xi32>
    %15 = arith.cmpi slt, %11, %14 : vector<1x32xi32>
    %16 = arith.andi %13, %15 : vector<1x32xi1>
    %17 = arith.extui %16 : vector<1x32xi1> to vector<1x32xi32>
    %18 = arith.sitofp %17 : vector<1x32xi32> to vector<1x32xf32>
    %c8_i32_5 = arith.constant 8 : i32
    %19 = vector.broadcast %c8_i32_5 : i32 to vector<1x32xi32>
    %20 = arith.cmpi sge, %11, %19 : vector<1x32xi32>
    %c16_i32 = arith.constant 16 : i32
    %21 = vector.broadcast %c16_i32 : i32 to vector<1x32xi32>
    %22 = arith.cmpi slt, %11, %21 : vector<1x32xi32>
    %23 = arith.andi %20, %22 : vector<1x32xi1>
    %24 = arith.extui %23 : vector<1x32xi1> to vector<1x32xi32>
    %25 = arith.sitofp %24 : vector<1x32xi32> to vector<1x32xf32>
    %c16_i32_6 = arith.constant 16 : i32
    %26 = vector.broadcast %c16_i32_6 : i32 to vector<1x32xi32>
    %27 = arith.cmpi sge, %11, %26 : vector<1x32xi32>
    %c24_i32 = arith.constant 24 : i32
    %28 = vector.broadcast %c24_i32 : i32 to vector<1x32xi32>
    %29 = arith.cmpi slt, %11, %28 : vector<1x32xi32>
    %30 = arith.andi %27, %29 : vector<1x32xi1>
    %31 = arith.extui %30 : vector<1x32xi1> to vector<1x32xi32>
    %32 = arith.sitofp %31 : vector<1x32xi32> to vector<1x32xf32>
    %c24_i32_7 = arith.constant 24 : i32
    %33 = vector.broadcast %c24_i32_7 : i32 to vector<1x32xi32>
    %34 = arith.cmpi sge, %11, %33 : vector<1x32xi32>
    %c32_i32 = arith.constant 32 : i32
    %35 = vector.broadcast %c32_i32 : i32 to vector<1x32xi32>
    %36 = arith.cmpi slt, %11, %35 : vector<1x32xi32>
    %37 = arith.andi %34, %36 : vector<1x32xi1>
    %38 = arith.extui %37 : vector<1x32xi1> to vector<1x32xi32>
    %39 = arith.sitofp %38 : vector<1x32xi32> to vector<1x32xf32>
    %c384 = arith.constant 384 : index
    %c0_8 = arith.constant 0 : index
    %40 = vector.load %arg2[%c384, %c0_8] : memref<992x128xf32, #tpu.memory_space<vmem>>, vector<32x32xf32>
    %c416 = arith.constant 416 : index
    %c0_9 = arith.constant 0 : index
    %41 = vector.load %arg2[%c416, %c0_9] : memref<992x128xf32, #tpu.memory_space<vmem>>, vector<32x32xf32>
    %c448 = arith.constant 448 : index
    %c0_10 = arith.constant 0 : index
    %42 = vector.load %arg2[%c448, %c0_10] : memref<992x128xf32, #tpu.memory_space<vmem>>, vector<32x32xf32>
    %c480 = arith.constant 480 : index
    %c0_11 = arith.constant 0 : index
    %43 = vector.load %arg2[%c480, %c0_11] : memref<992x128xf32, #tpu.memory_space<vmem>>, vector<32x32xf32>
    %c512 = arith.constant 512 : index
    %c0_12 = arith.constant 0 : index
    %44 = vector.load %arg2[%c512, %c0_12] : memref<992x128xf32, #tpu.memory_space<vmem>>, vector<32x128xf32>
    %c544 = arith.constant 544 : index
    %c0_13 = arith.constant 0 : index
    %45 = vector.load %arg2[%c544, %c0_13] : memref<992x128xf32, #tpu.memory_space<vmem>>, vector<128x32xf32>
    %c672 = arith.constant 672 : index
    %c0_14 = arith.constant 0 : index
    %46 = vector.load %arg2[%c672, %c0_14] : memref<992x128xf32, #tpu.memory_space<vmem>>, vector<1x32xf32>
    %c673 = arith.constant 673 : index
    %c0_15 = arith.constant 0 : index
    %47 = vector.load %arg2[%c673, %c0_15] : memref<992x128xf32, #tpu.memory_space<vmem>>, vector<1x32xf32>
    %c674 = arith.constant 674 : index
    %c0_16 = arith.constant 0 : index
    %48 = vector.load %arg2[%c674, %c0_16] : memref<992x128xf32, #tpu.memory_space<vmem>>, vector<1x32xf32>
    %c675 = arith.constant 675 : index
    %c0_17 = arith.constant 0 : index
    %49 = vector.load %arg2[%c675, %c0_17] : memref<992x128xf32, #tpu.memory_space<vmem>>, vector<1x32xf32>
    %c676 = arith.constant 676 : index
    %c0_18 = arith.constant 0 : index
    %50 = vector.load %arg2[%c676, %c0_18] : memref<992x128xf32, #tpu.memory_space<vmem>>, vector<1x32xf32>
    %c677 = arith.constant 677 : index
    %c0_19 = arith.constant 0 : index
    %51 = vector.load %arg2[%c677, %c0_19] : memref<992x128xf32, #tpu.memory_space<vmem>>, vector<1x32xf32>
    %c678 = arith.constant 678 : index
    %c0_20 = arith.constant 0 : index
    %52 = vector.load %arg2[%c678, %c0_20] : memref<992x128xf32, #tpu.memory_space<vmem>>, vector<1x128xf32>
    %c679 = arith.constant 679 : index
    %c0_21 = arith.constant 0 : index
    %53 = vector.load %arg2[%c679, %c0_21] : memref<992x128xf32, #tpu.memory_space<vmem>>, vector<1x32xf32>
    %c680 = arith.constant 680 : index
    %c0_22 = arith.constant 0 : index
    %54 = vector.load %arg2[%c680, %c0_22] : memref<992x128xf32, #tpu.memory_space<vmem>>, vector<1x32xf32>
    %c681 = arith.constant 681 : index
    %c0_23 = arith.constant 0 : index
    %55 = vector.load %arg2[%c681, %c0_23] : memref<992x128xf32, #tpu.memory_space<vmem>>, vector<1x32xf32>
    %cst_24 = arith.constant dense<0.000000e+00> : vector<8x32xf32>
    %56 = tpu.matmul %10, %40, %cst_24 {dimension_numbers = #tpu.dot_dimension_numbers<[1], [0], [0], [1], [0, 0, 1, 1], [], []>} : vector<8x32xf32>, vector<32x32xf32>, vector<8x32xf32> -> vector<8x32xf32>
    %57 = vector.broadcast %46 : vector<1x32xf32> to vector<8x32xf32>
    %58 = arith.addf %56, %57 : vector<8x32xf32>
    %cst_25 = arith.constant dense<0.000000e+00> : vector<8x32xf32>
    %59 = tpu.matmul %10, %41, %cst_25 {dimension_numbers = #tpu.dot_dimension_numbers<[1], [0], [0], [1], [0, 0, 1, 1], [], []>} : vector<8x32xf32>, vector<32x32xf32>, vector<8x32xf32> -> vector<8x32xf32>
    %60 = vector.broadcast %47 : vector<1x32xf32> to vector<8x32xf32>
    %61 = arith.addf %59, %60 : vector<8x32xf32>
    %cst_26 = arith.constant dense<0.000000e+00> : vector<8x32xf32>
    %62 = tpu.matmul %10, %42, %cst_26 {dimension_numbers = #tpu.dot_dimension_numbers<[1], [0], [0], [1], [0, 0, 1, 1], [], []>} : vector<8x32xf32>, vector<32x32xf32>, vector<8x32xf32> -> vector<8x32xf32>
    %63 = vector.broadcast %48 : vector<1x32xf32> to vector<8x32xf32>
    %64 = arith.addf %62, %63 : vector<8x32xf32>
    %cst_27 = arith.constant 0.353553385 : f32
    %65 = vector.broadcast %cst_27 : f32 to vector<8x32xf32>
    %66 = arith.mulf %58, %65 : vector<8x32xf32>
    %cst_28 = arith.constant 0.000000e+00 : f32
    %67 = vector.broadcast %cst_28 : f32 to vector<8x32xf32>
    %68 = vector.broadcast %18 : vector<1x32xf32> to vector<8x32xf32>
    %69 = arith.mulf %66, %68 : vector<8x32xf32>
    %cst_29 = arith.constant dense<0.000000e+00> : vector<8x8xf32>
    %70 = tpu.matmul %69, %61, %cst_29 {dimension_numbers = #tpu.dot_dimension_numbers<[1], [1], [0], [0], [0, 0, 1, 0], [], []>} : vector<8x32xf32>, vector<8x32xf32>, vector<8x8xf32> -> vector<8x8xf32>
    %cst_30 = arith.constant dense<0xFF800000> : vector<8xf32>
    %71 = vector.multi_reduction <maximumf>, %70, %cst_30 [1] : vector<8x8xf32> to vector<8xf32>
    %72 = vector.shape_cast %71 : vector<8xf32> to vector<8x1xf32>
    %73 = vector.broadcast %72 : vector<8x1xf32> to vector<8x8xf32>
    %74 = arith.subf %70, %73 : vector<8x8xf32>
    %75 = math.exp %74 : vector<8x8xf32>
    %cst_31 = arith.constant dense<0.000000e+00> : vector<8xf32>
    %76 = vector.multi_reduction <add>, %75, %cst_31 [1] : vector<8x8xf32> to vector<8xf32>
    %77 = vector.shape_cast %76 : vector<8xf32> to vector<8x1xf32>
    %78 = tpu.reciprocal %77 {approx = true} : vector<8x1xf32> -> vector<8x1xf32>
    %79 = vector.broadcast %78 : vector<8x1xf32> to vector<8x8xf32>
    %80 = arith.mulf %75, %79 : vector<8x8xf32>
    %81 = vector.broadcast %18 : vector<1x32xf32> to vector<8x32xf32>
    %82 = arith.mulf %64, %81 : vector<8x32xf32>
    %cst_32 = arith.constant dense<0.000000e+00> : vector<8x32xf32>
    %83 = tpu.matmul %80, %82, %cst_32 {dimension_numbers = #tpu.dot_dimension_numbers<[1], [0], [0], [1], [0, 0, 1, 1], [], []>} : vector<8x8xf32>, vector<8x32xf32>, vector<8x32xf32> -> vector<8x32xf32>
    %84 = arith.addf %67, %83 : vector<8x32xf32>
    %85 = vector.broadcast %25 : vector<1x32xf32> to vector<8x32xf32>
    %86 = arith.mulf %66, %85 : vector<8x32xf32>
    %cst_33 = arith.constant dense<0.000000e+00> : vector<8x8xf32>
    %87 = tpu.matmul %86, %61, %cst_33 {dimension_numbers = #tpu.dot_dimension_numbers<[1], [1], [0], [0], [0, 0, 1, 0], [], []>} : vector<8x32xf32>, vector<8x32xf32>, vector<8x8xf32> -> vector<8x8xf32>
    %cst_34 = arith.constant dense<0xFF800000> : vector<8xf32>
    %88 = vector.multi_reduction <maximumf>, %87, %cst_34 [1] : vector<8x8xf32> to vector<8xf32>
    %89 = vector.shape_cast %88 : vector<8xf32> to vector<8x1xf32>
    %90 = vector.broadcast %89 : vector<8x1xf32> to vector<8x8xf32>
    %91 = arith.subf %87, %90 : vector<8x8xf32>
    %92 = math.exp %91 : vector<8x8xf32>
    %cst_35 = arith.constant dense<0.000000e+00> : vector<8xf32>
    %93 = vector.multi_reduction <add>, %92, %cst_35 [1] : vector<8x8xf32> to vector<8xf32>
    %94 = vector.shape_cast %93 : vector<8xf32> to vector<8x1xf32>
    %95 = tpu.reciprocal %94 {approx = true} : vector<8x1xf32> -> vector<8x1xf32>
    %96 = vector.broadcast %95 : vector<8x1xf32> to vector<8x8xf32>
    %97 = arith.mulf %92, %96 : vector<8x8xf32>
    %98 = vector.broadcast %25 : vector<1x32xf32> to vector<8x32xf32>
    %99 = arith.mulf %64, %98 : vector<8x32xf32>
    %cst_36 = arith.constant dense<0.000000e+00> : vector<8x32xf32>
    %100 = tpu.matmul %97, %99, %cst_36 {dimension_numbers = #tpu.dot_dimension_numbers<[1], [0], [0], [1], [0, 0, 1, 1], [], []>} : vector<8x8xf32>, vector<8x32xf32>, vector<8x32xf32> -> vector<8x32xf32>
    %101 = arith.addf %84, %100 : vector<8x32xf32>
    %102 = vector.broadcast %32 : vector<1x32xf32> to vector<8x32xf32>
    %103 = arith.mulf %66, %102 : vector<8x32xf32>
    %cst_37 = arith.constant dense<0.000000e+00> : vector<8x8xf32>
    %104 = tpu.matmul %103, %61, %cst_37 {dimension_numbers = #tpu.dot_dimension_numbers<[1], [1], [0], [0], [0, 0, 1, 0], [], []>} : vector<8x32xf32>, vector<8x32xf32>, vector<8x8xf32> -> vector<8x8xf32>
    %cst_38 = arith.constant dense<0xFF800000> : vector<8xf32>
    %105 = vector.multi_reduction <maximumf>, %104, %cst_38 [1] : vector<8x8xf32> to vector<8xf32>
    %106 = vector.shape_cast %105 : vector<8xf32> to vector<8x1xf32>
    %107 = vector.broadcast %106 : vector<8x1xf32> to vector<8x8xf32>
    %108 = arith.subf %104, %107 : vector<8x8xf32>
    %109 = math.exp %108 : vector<8x8xf32>
    %cst_39 = arith.constant dense<0.000000e+00> : vector<8xf32>
    %110 = vector.multi_reduction <add>, %109, %cst_39 [1] : vector<8x8xf32> to vector<8xf32>
    %111 = vector.shape_cast %110 : vector<8xf32> to vector<8x1xf32>
    %112 = tpu.reciprocal %111 {approx = true} : vector<8x1xf32> -> vector<8x1xf32>
    %113 = vector.broadcast %112 : vector<8x1xf32> to vector<8x8xf32>
    %114 = arith.mulf %109, %113 : vector<8x8xf32>
    %115 = vector.broadcast %32 : vector<1x32xf32> to vector<8x32xf32>
    %116 = arith.mulf %64, %115 : vector<8x32xf32>
    %cst_40 = arith.constant dense<0.000000e+00> : vector<8x32xf32>
    %117 = tpu.matmul %114, %116, %cst_40 {dimension_numbers = #tpu.dot_dimension_numbers<[1], [0], [0], [1], [0, 0, 1, 1], [], []>} : vector<8x8xf32>, vector<8x32xf32>, vector<8x32xf32> -> vector<8x32xf32>
    %118 = arith.addf %101, %117 : vector<8x32xf32>
    %119 = vector.broadcast %39 : vector<1x32xf32> to vector<8x32xf32>
    %120 = arith.mulf %66, %119 : vector<8x32xf32>
    %cst_41 = arith.constant dense<0.000000e+00> : vector<8x8xf32>
    %121 = tpu.matmul %120, %61, %cst_41 {dimension_numbers = #tpu.dot_dimension_numbers<[1], [1], [0], [0], [0, 0, 1, 0], [], []>} : vector<8x32xf32>, vector<8x32xf32>, vector<8x8xf32> -> vector<8x8xf32>
    %cst_42 = arith.constant dense<0xFF800000> : vector<8xf32>
    %122 = vector.multi_reduction <maximumf>, %121, %cst_42 [1] : vector<8x8xf32> to vector<8xf32>
    %123 = vector.shape_cast %122 : vector<8xf32> to vector<8x1xf32>
    %124 = vector.broadcast %123 : vector<8x1xf32> to vector<8x8xf32>
    %125 = arith.subf %121, %124 : vector<8x8xf32>
    %126 = math.exp %125 : vector<8x8xf32>
    %cst_43 = arith.constant dense<0.000000e+00> : vector<8xf32>
    %127 = vector.multi_reduction <add>, %126, %cst_43 [1] : vector<8x8xf32> to vector<8xf32>
    %128 = vector.shape_cast %127 : vector<8xf32> to vector<8x1xf32>
    %129 = tpu.reciprocal %128 {approx = true} : vector<8x1xf32> -> vector<8x1xf32>
    %130 = vector.broadcast %129 : vector<8x1xf32> to vector<8x8xf32>
    %131 = arith.mulf %126, %130 : vector<8x8xf32>
    %132 = vector.broadcast %39 : vector<1x32xf32> to vector<8x32xf32>
    %133 = arith.mulf %64, %132 : vector<8x32xf32>
    %cst_44 = arith.constant dense<0.000000e+00> : vector<8x32xf32>
    %134 = tpu.matmul %131, %133, %cst_44 {dimension_numbers = #tpu.dot_dimension_numbers<[1], [0], [0], [1], [0, 0, 1, 1], [], []>} : vector<8x8xf32>, vector<8x32xf32>, vector<8x32xf32> -> vector<8x32xf32>
    %135 = arith.addf %118, %134 : vector<8x32xf32>
    %cst_45 = arith.constant dense<0.000000e+00> : vector<8x32xf32>
    %136 = tpu.matmul %135, %43, %cst_45 {dimension_numbers = #tpu.dot_dimension_numbers<[1], [0], [0], [1], [0, 0, 1, 1], [], []>} : vector<8x32xf32>, vector<32x32xf32>, vector<8x32xf32> -> vector<8x32xf32>
    %137 = vector.broadcast %49 : vector<1x32xf32> to vector<8x32xf32>
    %138 = arith.addf %136, %137 : vector<8x32xf32>
    %139 = arith.addf %10, %138 : vector<8x32xf32>
    %cst_46 = arith.constant dense<0.000000e+00> : vector<8xf32>
    %140 = vector.multi_reduction <add>, %139, %cst_46 [1] : vector<8x32xf32> to vector<8xf32>
    %141 = vector.shape_cast %140 : vector<8xf32> to vector<8x1xf32>
    %cst_47 = arith.constant 3.200000e+01 : f32
    %142 = vector.broadcast %cst_47 : f32 to vector<8x1xf32>
    %143 = arith.divf %141, %142 : vector<8x1xf32>
    %144 = vector.broadcast %143 : vector<8x1xf32> to vector<8x32xf32>
    %145 = arith.subf %139, %144 : vector<8x32xf32>
    %146 = arith.mulf %145, %145 : vector<8x32xf32>
    %cst_48 = arith.constant dense<0.000000e+00> : vector<8xf32>
    %147 = vector.multi_reduction <add>, %146, %cst_48 [1] : vector<8x32xf32> to vector<8xf32>
    %148 = vector.shape_cast %147 : vector<8xf32> to vector<8x1xf32>
    %cst_49 = arith.constant 3.200000e+01 : f32
    %149 = vector.broadcast %cst_49 : f32 to vector<8x1xf32>
    %150 = arith.divf %148, %149 : vector<8x1xf32>
    %cst_50 = arith.constant 9.99999974E-6 : f32
    %151 = vector.broadcast %cst_50 : f32 to vector<8x1xf32>
    %152 = arith.addf %150, %151 : vector<8x1xf32>
    %153 = math.rsqrt %152 : vector<8x1xf32>
    %154 = vector.broadcast %153 : vector<8x1xf32> to vector<8x32xf32>
    %155 = arith.mulf %145, %154 : vector<8x32xf32>
    %156 = vector.broadcast %50 : vector<1x32xf32> to vector<8x32xf32>
    %157 = arith.mulf %155, %156 : vector<8x32xf32>
    %158 = vector.broadcast %51 : vector<1x32xf32> to vector<8x32xf32>
    %159 = arith.addf %157, %158 : vector<8x32xf32>
    %cst_51 = arith.constant dense<0.000000e+00> : vector<8x128xf32>
    %160 = tpu.matmul %159, %44, %cst_51 {dimension_numbers = #tpu.dot_dimension_numbers<[1], [0], [0], [1], [0, 0, 1, 1], [], []>} : vector<8x32xf32>, vector<32x128xf32>, vector<8x128xf32> -> vector<8x128xf32>
    %161 = vector.broadcast %52 : vector<1x128xf32> to vector<8x128xf32>
    %162 = arith.addf %160, %161 : vector<8x128xf32>
    %cst_52 = arith.constant 5.000000e-01 : f32
    %163 = vector.broadcast %cst_52 : f32 to vector<8x128xf32>
    %164 = arith.mulf %163, %162 : vector<8x128xf32>
    %cst_53 = arith.constant 0.707106769 : f32
    %165 = vector.broadcast %cst_53 : f32 to vector<8x128xf32>
    %166 = arith.mulf %162, %165 : vector<8x128xf32>
    %167 = math.erf %166 : vector<8x128xf32>
    %cst_54 = arith.constant 1.000000e+00 : f32
    %168 = vector.broadcast %cst_54 : f32 to vector<8x128xf32>
    %169 = arith.addf %168, %167 : vector<8x128xf32>
    %170 = arith.mulf %164, %169 : vector<8x128xf32>
    %cst_55 = arith.constant dense<0.000000e+00> : vector<8x32xf32>
    %171 = tpu.matmul %170, %45, %cst_55 {dimension_numbers = #tpu.dot_dimension_numbers<[1], [0], [0], [1], [0, 0, 1, 1], [], []>} : vector<8x128xf32>, vector<128x32xf32>, vector<8x32xf32> -> vector<8x32xf32>
    %172 = vector.broadcast %53 : vector<1x32xf32> to vector<8x32xf32>
    %173 = arith.addf %171, %172 : vector<8x32xf32>
    %174 = arith.addf %159, %173 : vector<8x32xf32>
    %cst_56 = arith.constant dense<0.000000e+00> : vector<8xf32>
    %175 = vector.multi_reduction <add>, %174, %cst_56 [1] : vector<8x32xf32> to vector<8xf32>
    %176 = vector.shape_cast %175 : vector<8xf32> to vector<8x1xf32>
    %cst_57 = arith.constant 3.200000e+01 : f32
    %177 = vector.broadcast %cst_57 : f32 to vector<8x1xf32>
    %178 = arith.divf %176, %177 : vector<8x1xf32>
    %179 = vector.broadcast %178 : vector<8x1xf32> to vector<8x32xf32>
    %180 = arith.subf %174, %179 : vector<8x32xf32>
    %181 = arith.mulf %180, %180 : vector<8x32xf32>
    %cst_58 = arith.constant dense<0.000000e+00> : vector<8xf32>
    %182 = vector.multi_reduction <add>, %181, %cst_58 [1] : vector<8x32xf32> to vector<8xf32>
    %183 = vector.shape_cast %182 : vector<8xf32> to vector<8x1xf32>
    %cst_59 = arith.constant 3.200000e+01 : f32
    %184 = vector.broadcast %cst_59 : f32 to vector<8x1xf32>
    %185 = arith.divf %183, %184 : vector<8x1xf32>
    %cst_60 = arith.constant 9.99999974E-6 : f32
    %186 = vector.broadcast %cst_60 : f32 to vector<8x1xf32>
    %187 = arith.addf %185, %186 : vector<8x1xf32>
    %188 = math.rsqrt %187 : vector<8x1xf32>
    %189 = vector.broadcast %188 : vector<8x1xf32> to vector<8x32xf32>
    %190 = arith.mulf %180, %189 : vector<8x32xf32>
    %191 = vector.broadcast %54 : vector<1x32xf32> to vector<8x32xf32>
    %192 = arith.mulf %190, %191 : vector<8x32xf32>
    %193 = vector.broadcast %55 : vector<1x32xf32> to vector<8x32xf32>
    %194 = arith.addf %192, %193 : vector<8x32xf32>
    %c688 = arith.constant 688 : index
    %c0_61 = arith.constant 0 : index
    %195 = vector.load %arg2[%c688, %c0_61] : memref<992x128xf32, #tpu.memory_space<vmem>>, vector<32x32xf32>
    %c720 = arith.constant 720 : index
    %c0_62 = arith.constant 0 : index
    %196 = vector.load %arg2[%c720, %c0_62] : memref<992x128xf32, #tpu.memory_space<vmem>>, vector<32x32xf32>
    %c752 = arith.constant 752 : index
    %c0_63 = arith.constant 0 : index
    %197 = vector.load %arg2[%c752, %c0_63] : memref<992x128xf32, #tpu.memory_space<vmem>>, vector<32x32xf32>
    %c784 = arith.constant 784 : index
    %c0_64 = arith.constant 0 : index
    %198 = vector.load %arg2[%c784, %c0_64] : memref<992x128xf32, #tpu.memory_space<vmem>>, vector<32x32xf32>
    %c816 = arith.constant 816 : index
    %c0_65 = arith.constant 0 : index
    %199 = vector.load %arg2[%c816, %c0_65] : memref<992x128xf32, #tpu.memory_space<vmem>>, vector<32x128xf32>
    %c848 = arith.constant 848 : index
    %c0_66 = arith.constant 0 : index
    %200 = vector.load %arg2[%c848, %c0_66] : memref<992x128xf32, #tpu.memory_space<vmem>>, vector<128x32xf32>
    %c976 = arith.constant 976 : index
    %c0_67 = arith.constant 0 : index
    %201 = vector.load %arg2[%c976, %c0_67] : memref<992x128xf32, #tpu.memory_space<vmem>>, vector<1x32xf32>
    %c977 = arith.constant 977 : index
    %c0_68 = arith.constant 0 : index
    %202 = vector.load %arg2[%c977, %c0_68] : memref<992x128xf32, #tpu.memory_space<vmem>>, vector<1x32xf32>
    %c978 = arith.constant 978 : index
    %c0_69 = arith.constant 0 : index
    %203 = vector.load %arg2[%c978, %c0_69] : memref<992x128xf32, #tpu.memory_space<vmem>>, vector<1x32xf32>
    %c979 = arith.constant 979 : index
    %c0_70 = arith.constant 0 : index
    %204 = vector.load %arg2[%c979, %c0_70] : memref<992x128xf32, #tpu.memory_space<vmem>>, vector<1x32xf32>
    %c980 = arith.constant 980 : index
    %c0_71 = arith.constant 0 : index
    %205 = vector.load %arg2[%c980, %c0_71] : memref<992x128xf32, #tpu.memory_space<vmem>>, vector<1x32xf32>
    %c981 = arith.constant 981 : index
    %c0_72 = arith.constant 0 : index
    %206 = vector.load %arg2[%c981, %c0_72] : memref<992x128xf32, #tpu.memory_space<vmem>>, vector<1x32xf32>
    %c982 = arith.constant 982 : index
    %c0_73 = arith.constant 0 : index
    %207 = vector.load %arg2[%c982, %c0_73] : memref<992x128xf32, #tpu.memory_space<vmem>>, vector<1x128xf32>
    %c983 = arith.constant 983 : index
    %c0_74 = arith.constant 0 : index
    %208 = vector.load %arg2[%c983, %c0_74] : memref<992x128xf32, #tpu.memory_space<vmem>>, vector<1x32xf32>
    %c984 = arith.constant 984 : index
    %c0_75 = arith.constant 0 : index
    %209 = vector.load %arg2[%c984, %c0_75] : memref<992x128xf32, #tpu.memory_space<vmem>>, vector<1x32xf32>
    %c985 = arith.constant 985 : index
    %c0_76 = arith.constant 0 : index
    %210 = vector.load %arg2[%c985, %c0_76] : memref<992x128xf32, #tpu.memory_space<vmem>>, vector<1x32xf32>
    %cst_77 = arith.constant dense<0.000000e+00> : vector<8x32xf32>
    %211 = tpu.matmul %194, %195, %cst_77 {dimension_numbers = #tpu.dot_dimension_numbers<[1], [0], [0], [1], [0, 0, 1, 1], [], []>} : vector<8x32xf32>, vector<32x32xf32>, vector<8x32xf32> -> vector<8x32xf32>
    %212 = vector.broadcast %201 : vector<1x32xf32> to vector<8x32xf32>
    %213 = arith.addf %211, %212 : vector<8x32xf32>
    %cst_78 = arith.constant dense<0.000000e+00> : vector<8x32xf32>
    %214 = tpu.matmul %194, %196, %cst_78 {dimension_numbers = #tpu.dot_dimension_numbers<[1], [0], [0], [1], [0, 0, 1, 1], [], []>} : vector<8x32xf32>, vector<32x32xf32>, vector<8x32xf32> -> vector<8x32xf32>
    %215 = vector.broadcast %202 : vector<1x32xf32> to vector<8x32xf32>
    %216 = arith.addf %214, %215 : vector<8x32xf32>
    %cst_79 = arith.constant dense<0.000000e+00> : vector<8x32xf32>
    %217 = tpu.matmul %194, %197, %cst_79 {dimension_numbers = #tpu.dot_dimension_numbers<[1], [0], [0], [1], [0, 0, 1, 1], [], []>} : vector<8x32xf32>, vector<32x32xf32>, vector<8x32xf32> -> vector<8x32xf32>
    %218 = vector.broadcast %203 : vector<1x32xf32> to vector<8x32xf32>
    %219 = arith.addf %217, %218 : vector<8x32xf32>
    %cst_80 = arith.constant 0.353553385 : f32
    %220 = vector.broadcast %cst_80 : f32 to vector<8x32xf32>
    %221 = arith.mulf %213, %220 : vector<8x32xf32>
    %cst_81 = arith.constant 0.000000e+00 : f32
    %222 = vector.broadcast %cst_81 : f32 to vector<8x32xf32>
    %223 = vector.broadcast %18 : vector<1x32xf32> to vector<8x32xf32>
    %224 = arith.mulf %221, %223 : vector<8x32xf32>
    %cst_82 = arith.constant dense<0.000000e+00> : vector<8x8xf32>
    %225 = tpu.matmul %224, %216, %cst_82 {dimension_numbers = #tpu.dot_dimension_numbers<[1], [1], [0], [0], [0, 0, 1, 0], [], []>} : vector<8x32xf32>, vector<8x32xf32>, vector<8x8xf32> -> vector<8x8xf32>
    %cst_83 = arith.constant dense<0xFF800000> : vector<8xf32>
    %226 = vector.multi_reduction <maximumf>, %225, %cst_83 [1] : vector<8x8xf32> to vector<8xf32>
    %227 = vector.shape_cast %226 : vector<8xf32> to vector<8x1xf32>
    %228 = vector.broadcast %227 : vector<8x1xf32> to vector<8x8xf32>
    %229 = arith.subf %225, %228 : vector<8x8xf32>
    %230 = math.exp %229 : vector<8x8xf32>
    %cst_84 = arith.constant dense<0.000000e+00> : vector<8xf32>
    %231 = vector.multi_reduction <add>, %230, %cst_84 [1] : vector<8x8xf32> to vector<8xf32>
    %232 = vector.shape_cast %231 : vector<8xf32> to vector<8x1xf32>
    %233 = tpu.reciprocal %232 {approx = true} : vector<8x1xf32> -> vector<8x1xf32>
    %234 = vector.broadcast %233 : vector<8x1xf32> to vector<8x8xf32>
    %235 = arith.mulf %230, %234 : vector<8x8xf32>
    %236 = vector.broadcast %18 : vector<1x32xf32> to vector<8x32xf32>
    %237 = arith.mulf %219, %236 : vector<8x32xf32>
    %cst_85 = arith.constant dense<0.000000e+00> : vector<8x32xf32>
    %238 = tpu.matmul %235, %237, %cst_85 {dimension_numbers = #tpu.dot_dimension_numbers<[1], [0], [0], [1], [0, 0, 1, 1], [], []>} : vector<8x8xf32>, vector<8x32xf32>, vector<8x32xf32> -> vector<8x32xf32>
    %239 = arith.addf %222, %238 : vector<8x32xf32>
    %240 = vector.broadcast %25 : vector<1x32xf32> to vector<8x32xf32>
    %241 = arith.mulf %221, %240 : vector<8x32xf32>
    %cst_86 = arith.constant dense<0.000000e+00> : vector<8x8xf32>
    %242 = tpu.matmul %241, %216, %cst_86 {dimension_numbers = #tpu.dot_dimension_numbers<[1], [1], [0], [0], [0, 0, 1, 0], [], []>} : vector<8x32xf32>, vector<8x32xf32>, vector<8x8xf32> -> vector<8x8xf32>
    %cst_87 = arith.constant dense<0xFF800000> : vector<8xf32>
    %243 = vector.multi_reduction <maximumf>, %242, %cst_87 [1] : vector<8x8xf32> to vector<8xf32>
    %244 = vector.shape_cast %243 : vector<8xf32> to vector<8x1xf32>
    %245 = vector.broadcast %244 : vector<8x1xf32> to vector<8x8xf32>
    %246 = arith.subf %242, %245 : vector<8x8xf32>
    %247 = math.exp %246 : vector<8x8xf32>
    %cst_88 = arith.constant dense<0.000000e+00> : vector<8xf32>
    %248 = vector.multi_reduction <add>, %247, %cst_88 [1] : vector<8x8xf32> to vector<8xf32>
    %249 = vector.shape_cast %248 : vector<8xf32> to vector<8x1xf32>
    %250 = tpu.reciprocal %249 {approx = true} : vector<8x1xf32> -> vector<8x1xf32>
    %251 = vector.broadcast %250 : vector<8x1xf32> to vector<8x8xf32>
    %252 = arith.mulf %247, %251 : vector<8x8xf32>
    %253 = vector.broadcast %25 : vector<1x32xf32> to vector<8x32xf32>
    %254 = arith.mulf %219, %253 : vector<8x32xf32>
    %cst_89 = arith.constant dense<0.000000e+00> : vector<8x32xf32>
    %255 = tpu.matmul %252, %254, %cst_89 {dimension_numbers = #tpu.dot_dimension_numbers<[1], [0], [0], [1], [0, 0, 1, 1], [], []>} : vector<8x8xf32>, vector<8x32xf32>, vector<8x32xf32> -> vector<8x32xf32>
    %256 = arith.addf %239, %255 : vector<8x32xf32>
    %257 = vector.broadcast %32 : vector<1x32xf32> to vector<8x32xf32>
    %258 = arith.mulf %221, %257 : vector<8x32xf32>
    %cst_90 = arith.constant dense<0.000000e+00> : vector<8x8xf32>
    %259 = tpu.matmul %258, %216, %cst_90 {dimension_numbers = #tpu.dot_dimension_numbers<[1], [1], [0], [0], [0, 0, 1, 0], [], []>} : vector<8x32xf32>, vector<8x32xf32>, vector<8x8xf32> -> vector<8x8xf32>
    %cst_91 = arith.constant dense<0xFF800000> : vector<8xf32>
    %260 = vector.multi_reduction <maximumf>, %259, %cst_91 [1] : vector<8x8xf32> to vector<8xf32>
    %261 = vector.shape_cast %260 : vector<8xf32> to vector<8x1xf32>
    %262 = vector.broadcast %261 : vector<8x1xf32> to vector<8x8xf32>
    %263 = arith.subf %259, %262 : vector<8x8xf32>
    %264 = math.exp %263 : vector<8x8xf32>
    %cst_92 = arith.constant dense<0.000000e+00> : vector<8xf32>
    %265 = vector.multi_reduction <add>, %264, %cst_92 [1] : vector<8x8xf32> to vector<8xf32>
    %266 = vector.shape_cast %265 : vector<8xf32> to vector<8x1xf32>
    %267 = tpu.reciprocal %266 {approx = true} : vector<8x1xf32> -> vector<8x1xf32>
    %268 = vector.broadcast %267 : vector<8x1xf32> to vector<8x8xf32>
    %269 = arith.mulf %264, %268 : vector<8x8xf32>
    %270 = vector.broadcast %32 : vector<1x32xf32> to vector<8x32xf32>
    %271 = arith.mulf %219, %270 : vector<8x32xf32>
    %cst_93 = arith.constant dense<0.000000e+00> : vector<8x32xf32>
    %272 = tpu.matmul %269, %271, %cst_93 {dimension_numbers = #tpu.dot_dimension_numbers<[1], [0], [0], [1], [0, 0, 1, 1], [], []>} : vector<8x8xf32>, vector<8x32xf32>, vector<8x32xf32> -> vector<8x32xf32>
    %273 = arith.addf %256, %272 : vector<8x32xf32>
    %274 = vector.broadcast %39 : vector<1x32xf32> to vector<8x32xf32>
    %275 = arith.mulf %221, %274 : vector<8x32xf32>
    %cst_94 = arith.constant dense<0.000000e+00> : vector<8x8xf32>
    %276 = tpu.matmul %275, %216, %cst_94 {dimension_numbers = #tpu.dot_dimension_numbers<[1], [1], [0], [0], [0, 0, 1, 0], [], []>} : vector<8x32xf32>, vector<8x32xf32>, vector<8x8xf32> -> vector<8x8xf32>
    %cst_95 = arith.constant dense<0xFF800000> : vector<8xf32>
    %277 = vector.multi_reduction <maximumf>, %276, %cst_95 [1] : vector<8x8xf32> to vector<8xf32>
    %278 = vector.shape_cast %277 : vector<8xf32> to vector<8x1xf32>
    %279 = vector.broadcast %278 : vector<8x1xf32> to vector<8x8xf32>
    %280 = arith.subf %276, %279 : vector<8x8xf32>
    %281 = math.exp %280 : vector<8x8xf32>
    %cst_96 = arith.constant dense<0.000000e+00> : vector<8xf32>
    %282 = vector.multi_reduction <add>, %281, %cst_96 [1] : vector<8x8xf32> to vector<8xf32>
    %283 = vector.shape_cast %282 : vector<8xf32> to vector<8x1xf32>
    %284 = tpu.reciprocal %283 {approx = true} : vector<8x1xf32> -> vector<8x1xf32>
    %285 = vector.broadcast %284 : vector<8x1xf32> to vector<8x8xf32>
    %286 = arith.mulf %281, %285 : vector<8x8xf32>
    %287 = vector.broadcast %39 : vector<1x32xf32> to vector<8x32xf32>
    %288 = arith.mulf %219, %287 : vector<8x32xf32>
    %cst_97 = arith.constant dense<0.000000e+00> : vector<8x32xf32>
    %289 = tpu.matmul %286, %288, %cst_97 {dimension_numbers = #tpu.dot_dimension_numbers<[1], [0], [0], [1], [0, 0, 1, 1], [], []>} : vector<8x8xf32>, vector<8x32xf32>, vector<8x32xf32> -> vector<8x32xf32>
    %290 = arith.addf %273, %289 : vector<8x32xf32>
    %cst_98 = arith.constant dense<0.000000e+00> : vector<8x32xf32>
    %291 = tpu.matmul %290, %198, %cst_98 {dimension_numbers = #tpu.dot_dimension_numbers<[1], [0], [0], [1], [0, 0, 1, 1], [], []>} : vector<8x32xf32>, vector<32x32xf32>, vector<8x32xf32> -> vector<8x32xf32>
    %292 = vector.broadcast %204 : vector<1x32xf32> to vector<8x32xf32>
    %293 = arith.addf %291, %292 : vector<8x32xf32>
    %294 = arith.addf %194, %293 : vector<8x32xf32>
    %cst_99 = arith.constant dense<0.000000e+00> : vector<8xf32>
    %295 = vector.multi_reduction <add>, %294, %cst_99 [1] : vector<8x32xf32> to vector<8xf32>
    %296 = vector.shape_cast %295 : vector<8xf32> to vector<8x1xf32>
    %cst_100 = arith.constant 3.200000e+01 : f32
    %297 = vector.broadcast %cst_100 : f32 to vector<8x1xf32>
    %298 = arith.divf %296, %297 : vector<8x1xf32>
    %299 = vector.broadcast %298 : vector<8x1xf32> to vector<8x32xf32>
    %300 = arith.subf %294, %299 : vector<8x32xf32>
    %301 = arith.mulf %300, %300 : vector<8x32xf32>
    %cst_101 = arith.constant dense<0.000000e+00> : vector<8xf32>
    %302 = vector.multi_reduction <add>, %301, %cst_101 [1] : vector<8x32xf32> to vector<8xf32>
    %303 = vector.shape_cast %302 : vector<8xf32> to vector<8x1xf32>
    %cst_102 = arith.constant 3.200000e+01 : f32
    %304 = vector.broadcast %cst_102 : f32 to vector<8x1xf32>
    %305 = arith.divf %303, %304 : vector<8x1xf32>
    %cst_103 = arith.constant 9.99999974E-6 : f32
    %306 = vector.broadcast %cst_103 : f32 to vector<8x1xf32>
    %307 = arith.addf %305, %306 : vector<8x1xf32>
    %308 = math.rsqrt %307 : vector<8x1xf32>
    %309 = vector.broadcast %308 : vector<8x1xf32> to vector<8x32xf32>
    %310 = arith.mulf %300, %309 : vector<8x32xf32>
    %311 = vector.broadcast %205 : vector<1x32xf32> to vector<8x32xf32>
    %312 = arith.mulf %310, %311 : vector<8x32xf32>
    %313 = vector.broadcast %206 : vector<1x32xf32> to vector<8x32xf32>
    %314 = arith.addf %312, %313 : vector<8x32xf32>
    %cst_104 = arith.constant dense<0.000000e+00> : vector<8x128xf32>
    %315 = tpu.matmul %314, %199, %cst_104 {dimension_numbers = #tpu.dot_dimension_numbers<[1], [0], [0], [1], [0, 0, 1, 1], [], []>} : vector<8x32xf32>, vector<32x128xf32>, vector<8x128xf32> -> vector<8x128xf32>
    %316 = vector.broadcast %207 : vector<1x128xf32> to vector<8x128xf32>
    %317 = arith.addf %315, %316 : vector<8x128xf32>
    %cst_105 = arith.constant 5.000000e-01 : f32
    %318 = vector.broadcast %cst_105 : f32 to vector<8x128xf32>
    %319 = arith.mulf %318, %317 : vector<8x128xf32>
    %cst_106 = arith.constant 0.707106769 : f32
    %320 = vector.broadcast %cst_106 : f32 to vector<8x128xf32>
    %321 = arith.mulf %317, %320 : vector<8x128xf32>
    %322 = math.erf %321 : vector<8x128xf32>
    %cst_107 = arith.constant 1.000000e+00 : f32
    %323 = vector.broadcast %cst_107 : f32 to vector<8x128xf32>
    %324 = arith.addf %323, %322 : vector<8x128xf32>
    %325 = arith.mulf %319, %324 : vector<8x128xf32>
    %cst_108 = arith.constant dense<0.000000e+00> : vector<8x32xf32>
    %326 = tpu.matmul %325, %200, %cst_108 {dimension_numbers = #tpu.dot_dimension_numbers<[1], [0], [0], [1], [0, 0, 1, 1], [], []>} : vector<8x128xf32>, vector<128x32xf32>, vector<8x32xf32> -> vector<8x32xf32>
    %327 = vector.broadcast %208 : vector<1x32xf32> to vector<8x32xf32>
    %328 = arith.addf %326, %327 : vector<8x32xf32>
    %329 = arith.addf %314, %328 : vector<8x32xf32>
    %cst_109 = arith.constant dense<0.000000e+00> : vector<8xf32>
    %330 = vector.multi_reduction <add>, %329, %cst_109 [1] : vector<8x32xf32> to vector<8xf32>
    %331 = vector.shape_cast %330 : vector<8xf32> to vector<8x1xf32>
    %cst_110 = arith.constant 3.200000e+01 : f32
    %332 = vector.broadcast %cst_110 : f32 to vector<8x1xf32>
    %333 = arith.divf %331, %332 : vector<8x1xf32>
    %334 = vector.broadcast %333 : vector<8x1xf32> to vector<8x32xf32>
    %335 = arith.subf %329, %334 : vector<8x32xf32>
    %336 = arith.mulf %335, %335 : vector<8x32xf32>
    %cst_111 = arith.constant dense<0.000000e+00> : vector<8xf32>
    %337 = vector.multi_reduction <add>, %336, %cst_111 [1] : vector<8x32xf32> to vector<8xf32>
    %338 = vector.shape_cast %337 : vector<8xf32> to vector<8x1xf32>
    %cst_112 = arith.constant 3.200000e+01 : f32
    %339 = vector.broadcast %cst_112 : f32 to vector<8x1xf32>
    %340 = arith.divf %338, %339 : vector<8x1xf32>
    %cst_113 = arith.constant 9.99999974E-6 : f32
    %341 = vector.broadcast %cst_113 : f32 to vector<8x1xf32>
    %342 = arith.addf %340, %341 : vector<8x1xf32>
    %343 = math.rsqrt %342 : vector<8x1xf32>
    %344 = vector.broadcast %343 : vector<8x1xf32> to vector<8x32xf32>
    %345 = arith.mulf %335, %344 : vector<8x32xf32>
    %346 = vector.broadcast %209 : vector<1x32xf32> to vector<8x32xf32>
    %347 = arith.mulf %345, %346 : vector<8x32xf32>
    %348 = vector.broadcast %210 : vector<1x32xf32> to vector<8x32xf32>
    %349 = arith.addf %347, %348 : vector<8x32xf32>
    %c344 = arith.constant 344 : index
    %c0_114 = arith.constant 0 : index
    %350 = vector.load %arg2[%c344, %c0_114] : memref<992x128xf32, #tpu.memory_space<vmem>>, vector<32x128xf32>
    %c376 = arith.constant 376 : index
    %c0_115 = arith.constant 0 : index
    %351 = vector.load %arg2[%c376, %c0_115] : memref<992x128xf32, #tpu.memory_space<vmem>>, vector<1x128xf32>
    %cst_116 = arith.constant dense<0.000000e+00> : vector<8x128xf32>
    %352 = tpu.matmul %349, %350, %cst_116 {dimension_numbers = #tpu.dot_dimension_numbers<[1], [0], [0], [1], [0, 0, 1, 1], [], []>} : vector<8x32xf32>, vector<32x128xf32>, vector<8x128xf32> -> vector<8x128xf32>
    %353 = vector.broadcast %351 : vector<1x128xf32> to vector<8x128xf32>
    %354 = arith.addf %352, %353 : vector<8x128xf32>
    %c0_117 = arith.constant 0 : index
    %c0_118 = arith.constant 0 : index
    %c0_119 = arith.constant 0 : index
    %355 = vector.load %arg3[%c0_117, %c0_118, %c0_119] : memref<1x8x128xf32, #tpu.memory_space<vmem>>, vector<1x8x128xf32>
    %356 = vector.shape_cast %355 : vector<1x8x128xf32> to vector<8x128xf32>
    %357 = vector.shape_cast %354 : vector<8x128xf32> to vector<1x8x128xf32>
    tpu.vector_store %arg3[%c0_117, %c0_118, %c0_119], %357 {strides = array<i32>} : memref<1x8x128xf32, #tpu.memory_space<vmem>>, vector<1x8x128xf32>,
    %cst_120 = arith.constant 0.000000e+00 : f32
    %358 = vector.broadcast %cst_120 : f32 to vector<8x96xf32>
    %359 = tpu.concatenate %349, %358 in 1 : vector<8x32xf32>, vector<8x96xf32> -> vector<8x128xf32>
    %c0_121 = arith.constant 0 : index
    %c0_122 = arith.constant 0 : index
    %c0_123 = arith.constant 0 : index
    %360 = vector.load %arg4[%c0_121, %c0_122, %c0_123] : memref<1x8x128xf32, #tpu.memory_space<vmem>>, vector<1x8x128xf32>
    %361 = vector.shape_cast %360 : vector<1x8x128xf32> to vector<8x128xf32>
    %362 = vector.shape_cast %359 : vector<8x128xf32> to vector<1x8x128xf32>
    tpu.vector_store %arg4[%c0_121, %c0_122, %c0_123], %362 {strides = array<i32>} : memref<1x8x128xf32, #tpu.memory_space<vmem>>, vector<1x8x128xf32>,
    return
  }
  func.func @transform_0(%arg0: i32) -> (i32, i32, i32) {
    %c0_i32 = arith.constant 0 : i32
    %c0_i32_0 = arith.constant 0 : i32
    %c0_i32_1 = arith.constant 0 : i32
    return %arg0, %c0_i32, %c0_i32_0 : i32, i32, i32
  }
  func.func @transform_1(%arg0: i32) -> (i32, i32) {
    %c0_i32 = arith.constant 0 : i32
    %c0_i32_0 = arith.constant 0 : i32
    %c0_i32_1 = arith.constant 0 : i32
    return %c0_i32, %c0_i32_0 : i32, i32
  }
  func.func @transform_2(%arg0: i32) -> (i32, i32, i32) {
    %c0_i32 = arith.constant 0 : i32
    %c0_i32_0 = arith.constant 0 : i32
    %c0_i32_1 = arith.constant 0 : i32
    return %arg0, %c0_i32, %c0_i32_0 : i32, i32, i32
  }
  func.func @transform_3(%arg0: i32) -> (i32, i32, i32) {
    %c0_i32 = arith.constant 0 : i32
    %c0_i32_0 = arith.constant 0 : i32
    %c0_i32_1 = arith.constant 0 : i32
    return %arg0, %c0_i32, %c0_i32_0 : i32, i32, i32
  }
}

</mosaic_0001>

<bundles_post_ra>
// kernel: forward.1
= control target key start
LH: loop header
LB: loop body
LE: loop exit
PB: predicated region body
PF: predicated region fallthrough
CT: control target
= control target key end

     0   :  { %9 = vsyncpa [#allocation3], 0  ;;  %s4129_s0 = inlined_call_operand.vmem [shape: s32[2,8,1], index: 0, kind: input, shape index: {}]   ;;  %s4130_s1 = inlined_call_operand.hbm [shape: f32[992,128], index: 1, kind: input, shape index: {}]   ;;  %s4131_s2 = inlined_call_operand.hbm [shape: f32[2,8,128], index: 2, kind: output, shape index: {0}]   ;;  %s4132_s3 = inlined_call_operand.hbm [shape: f32[2,8,128], index: 3, kind: output, shape index: {1}]  }
   0x1   :  { %10 = vsyncpa [#allocation4], 0 }
   0x2   :  { %12 = vsyncpa [#allocation4 + $0x1], 0 }
   0x3   :  { %13 = vsyncpa [#allocation7], 0 }
   0x4   :  { %15 = vsyncpa [#allocation7 + $0x1], 0  ;;  %s3697_s12 = smov 0   ;;  %s3699_s13 = smov 0  }
   0x5   :  { %s3701_s14 = smov 0   ;;  %s3703_s15 = smov 0  }
   0x6 LB: > { %s3718_s16 = sadd.s32 4294967295, %s3666_s15   ;;  %s2919_s17 = sadd.s32 4294967294, %s3666_s15   ;;  %s3666_s15 = sphi %s3703_s15, %s4140_s15   ;;  %s3662_s14 = sphi %s3701_s14, %s4139_s14   ;;  %s3658_s13 = sphi %s3699_s13, %s4138_s13   ;;  %s3654_s12 = sphi %s3697_s12, %s4137_s12  }
   0x7   : > { %s3722_s18 = sadd.s32 1, %s3666_s15   ;;  %s75_s19 = sadd.s32 1, %s3662_s14 }
   0x8   : > { %s72_s20 = ssub.s32 %s3666_s15, %s3722_s18  ;;  %p85_p0 = scmp.ne.s32.totalorder %s3662_s14, %s3658_s13 }
   0x9   : > { %p73_p1 = scmp.eq.s32.totalorder %s72_s20, 0  ;;  %p86_p2 = scmp.eq.s32.totalorder %s3718_s16, 1 }
   0xa   : > { %p91_p3 = scmp.ne.s32.totalorder %s3658_s13, %s3654_s12  ;;  %p92_p4 = scmp.eq.s32.totalorder %s2919_s17, 1 }
   0xb   : > { %s3733_s21 = scalar_select %p73_p1, %s3662_s14, %s75_s19  }
   0xc   : > { %p3735_p5 = por %p86_p2, %p85_p0  ;;  %p3739_p6 = por %p92_p4, %p91_p3 }
   0xd   : > { %p2920_p7 = scmp.ge.s32.totalorder %s3666_s15, 1  ;;  %p125_p8 = scmp.lt.s32.totalorder %s3666_s15, 3 }
   0xe   : > { %s4134_s23 = scalar_select %p3739_p6, 1, 0 }
   0xf   : > { %p3459_p9 = scmp.eq.s32.totalorder %s3718_s16, 0  ;;  %p3746_p10 = pnand %p2920_p7, %p125_p8 }
  0x10   : > { %s3668_s25 = smov [#allocation2]  }
  0x11   : > { %s137_s26 = sshll.u32 %s3668_s25, 4  ;;  %p3448_p11 = pneg %p3746_p10  ;;  %s138_s26 = int_to_ptr.vmem [resolvable:$true] %s137_s26 }
  0x12   : > { %s3557_s27 = scalar_lea.vmem %s138_s26, 15872  ;;  %p3565_p3 = scmp.lt.s32.totalorder %s138_s26, %s138_s26 }
  0x13   : > { %p3449_p12 = pnand %p3459_p9, %p3448_p11  ;;  %p3558_p0 = scmp.ne.s32.totalorder %s138_s26, %s3557_s27 }
  0x14   : > { %p3566_p4 = scmp.lt.s32.totalorder %s3557_s27, %s3557_s27 }
  0x15   : > { %p3548_p13 = pneg %p3449_p12 }
  0x16   : > { %p3567_p6 = por %p3566_p4, %p3565_p3 }
  0x17   : > { %p3560_p1 = pnand %p3558_p0, %p3548_p13 }
  0x19   : > { %p3561_p2 = pneg %p3560_p1 }
  0x1b   : > { %p3568_p7 = pnand %p3567_p6, %p3561_p2 }
  0x1d   : > { %3571 = shalt.err (!%p3568_p7)
}
  0x1e   : > { %s3669_s28 = smov 128   ;;  %s3670_s29 = smov 8  }
  0x1f   : > { %3451 = dma.hbm_to_vmem [thread:$0]  (!%p3449_p12), %s4130_s1, 15872, %s138_s26, [#allocation3], %s3669_s28, %s3669_s28, %s3670_s29  }
  0x20   : > { %160 = sbr.rel (%p3746_p10) target bundleno = 5368 (0x14f8), region = 28 }
  0x25   : > { %3641 = dma.done.wait (%p3459_p9), [#allocation3], 15872  }
  0x26   : > { %3643 = vsyncadd (%p3459_p9), [#allocation3], 4294951424  ;;  %p188_p8 = scmp.lt.s32.totalorder %s3718_s16, 1  ;;  %v3671_v0 = vmov 0   ;;  %v3672_v1 = vmov 0.0   ;;  %vm3673_vm0 = vmmov 0   ;;  %v193_v22 = vlaneseq }
  0x27   : > { %3501 = vset.pattern.permute.xlu0 %v3671_v0  ;;  %3134 = vmatprep.subr.mxu0 %v3672_v1  ;;  %v216_v3 = vld [vmem:[#allocation2 + $0x78] sm:$0xff]  ;;  %v215_v4 = vld [vmem:[#allocation2 + $0x70] sm:$0xff]  ;;  %v214_v5 = vld [vmem:[#allocation2 + $0x68] sm:$0xff]  ;;  %v3674_v25 = vmov 1.0   ;;  %vm358_vm2 = vcmask 261120   ;;  %vm658_vm13 = vcmask 64512  }
  0x28   : > { %s189_s5 = scalar_select %p188_p8, %s3718_s16, 1  ;;  %3169 = vmatprep.subr.mxu1 %v3672_v1  ;;  %3166 = vmatprep.mubr.msk.f32.mxu0 %vm3673_vm0, %v3672_v1  ;;  %v213_v6 = vld [vmem:[#allocation2 + $0x60] sm:$0xff]  ;;  %v311_v7 = vld [vmem:[#allocation2 + $0x198] sm:$0xff]  ;;  %v310_v9 = vld [vmem:[#allocation2 + $0x190] sm:$0xff]  ;;  %v3793_v23 = vand.u32 127, %v193_v22 }
  0x29   : > { %3177 = vmatprep.mubr.msk.f32.mxu1 %vm3673_vm0, %v3672_v1  ;;  %3135 = vmatpush3.msra.mxu0 %v216_v3  ;;  %v212_v8 = vld [vmem:[#allocation2 + $0x58] sm:$0xff]  ;;  %v309_v10 = vld [vmem:[#allocation2 + $0x188] sm:$0xff]  ;;  %v211_v11 = vld [vmem:[#allocation2 + $0x50] sm:$0xff]  ;;  %s4060_s10 = sand.u32 1, %s3658_s13   ;;  %s2992_s19 = sshll.u32 %s3718_s16, 7 }
  0x2a   : > { %s2927_s6 = sshll.u32 %s189_s5, 3  ;;  %3136 = vmatprep.subr.mxu0 %v3672_v1  ;;  %3170 = vmatpush3.msra.mxu1 %v311_v7  ;;  %v210_v12 = vld [vmem:[#allocation2 + $0x48] sm:$0xff]  ;;  %v209_v13 = vld [vmem:[#allocation2 + $0x40] sm:$0xff]  ;;  %v208_v14 = vld [vmem:[#allocation2 + $0x38] sm:$0xff]  ;;  %vm298_vm3 = vcmp.ge.s32.totalorder %v3793_v23, 16  ;;  %vm299_vm4 = vcmp.lt.s32.totalorder %v3793_v23, 24  ;;  %s2814_s25 = scalar_lea.hbm %s4132_s3, %s2992_s19 }
  0x2b   : > { %s191_s9 = scalar_lea.vmem %s4129_s0, %s2927_s6  ;;  %3137 = vmatpush3.msra.mxu0 %v215_v4  ;;  %3171 = vmatprep.subr.mxu1 %v3672_v1  ;;  %v207_v15 = vld [vmem:[#allocation2 + $0x30] sm:$0xff]  ;;  %v206_v16 = vld [vmem:[#allocation2 + $0x28] sm:$0xff]  ;;  %v205_v17 = vld [vmem:[#allocation2 + $0x20] sm:$0xff]  ;;  %vm289_vm5 = vcmp.lt.s32.totalorder %v3793_v23, 8  ;;  %vm293_vm6 = vcmp.ge.s32.totalorder %v3793_v23, 8  ;;  %vm294_vm7 = vcmp.lt.s32.totalorder %v3793_v23, 16 }
  0x2c   : > { %v192_v2 = vld [vmem:[%s191_s9] sm:$0xff]  ;;  %3138 = vmatprep.subr.mxu0 %v3672_v1  ;;  %3172 = vmatpush3.msra.mxu1 %v310_v9  ;;  %v204_v18 = vld [vmem:[#allocation2 + $0x18] sm:$0xff]  ;;  %v203_v19 = vld [vmem:[#allocation2 + $0x10] sm:$0xff]  ;;  %vm303_vm9 = vcmp.ge.s32.totalorder %v3793_v23, 24  ;;  %vm304_vm10 = vcmp.lt.s32.totalorder %v3793_v23, 32  ;;  %v3829_v46 = vsel %vm289_vm5, 1.0, %v3672_v1 }
  0x2d   : > { %196 = vperm.xlu0 %3501, %v192_v2   ;;  %3139 = vmatpush3.msra.mxu0 %v214_v5  ;;  %v202_v20 = vld [vmem:[#allocation2 + $0x8] sm:$0xff]  ;;  %v201_v21 = vld [vmem:[#allocation2] sm:$0xff]  ;;  %v315_v30 = vld [vmem:[#allocation2 + $0x1b8] sm:$0xff]  ;;  %s2925_s11 = sshll.u32 %s4060_s10, 3  ;;  %s2790_s27 = scalar_lea.sflag [#allocation7], %s4060_s10 }
  0x2e   : > { %3140 = vmatprep.subr.mxu0 %v3672_v1  ;;  %3173 = vmatprep.subr.mxu1 %v3672_v1  ;;  %v308_v26 = vld [vmem:[#allocation2 + $0x180] sm:$0xff]  ;;  %v314_v32 = vld [vmem:[#allocation2 + $0x1b0] sm:$0xff]  ;;  %v313_v33 = vld [vmem:[#allocation2 + $0x1a8] sm:$0xff]  ;;  %s187_s17 = scalar_lea.vmem [#allocation6], %s2925_s11  ;;  %s3675_s29 = smov [#allocation6]  }
  0x2f   : > { %3141 = vmatpush3.msra.mxu0 %v213_v6  ;;  %3174 = vmatpush3.msra.mxu1 %v309_v10  ;;  %v217_v27 = vld [vmem:[#allocation2 + $0x80] sm:$0xff]  ;;  %v319_v35 = vld [vmem:[#allocation2 + $0x1d8] sm:$0xff]  ;;  %v318_v36 = vld [vmem:[#allocation2 + $0x1d0] sm:$0xff]  ;;  %s2816_s26 = sshll.u32 %s187_s17, 4  ;;  %s3576_s30 = sshll.u32 %s3675_s29, 4  ;;  %s2817_s26 = int_to_ptr.vmem [resolvable:$true] %s2816_s26  ;;  %s3577_s30 = int_to_ptr.vmem [resolvable:$false] %s3576_s30 }
  0x30   : > { %3142 = vmatprep.subr.mxu0 %v3672_v1  ;;  %3175 = vmatprep.subr.mxu1 %v3672_v1  ;;  %v312_v34 = vld [vmem:[#allocation2 + $0x1a0] sm:$0xff]  ;;  %v317_v37 = vld [vmem:[#allocation2 + $0x1c8] sm:$0xff]  ;;  %vm300_vm8 = vmand %vm298_vm3, %vm299_vm4  ;;  %s3572_s28 = scalar_lea.vmem %s2817_s26, 128  ;;  %s3578_s4 = scalar_lea.vmem %s3577_s30, 256 }
  0x31   : > { %3143 = vmatpush3.msra.mxu0 %v212_v8  ;;  %3176 = vmatpush3.msra.mxu1 %v308_v26  ;;  %v316_v38 = vld [vmem:[#allocation2 + $0x1c0] sm:$0xff]  ;;  %vm295_vm11 = vmand %vm293_vm6, %vm294_vm7  ;;  %v3832_v47 = vsel %vm300_vm8, 1.0, %v3672_v1  ;;  %p3573_p6 = scmp.ne.s32.totalorder %s2817_s26, %s3572_s28  ;;  %p3579_p11 = scmp.lt.s32.totalorder %s2817_s26, %s3577_s30 }
  0x32   : > { %3144 = vmatprep.subr.mxu0 %v3672_v1  ;;  %3180 = vmatprep.subr.mxu1 %v3672_v1  ;;  %v2934_v40 = vld [vmem:[#allocation2 + $0x2a0] ss:$0 sm:$0xff]  ;;  %v2936_v43 = vld [vmem:[#allocation2 + $0x2a1] ss:$0 sm:$0xff]  ;;  %vm305_vm12 = vmand %vm303_vm9, %vm304_vm10  ;;  %v3841_v52 = vsel %vm295_vm11, 1.0, %v3672_v1  ;;  %p3580_p12 = scmp.lt.s32.totalorder %s3578_s4, %s3572_s28 }
  0x33   : > { %3145 = vmatpush3.msra.mxu0 %v211_v11  ;;  %v3844_v53 = vsel %vm305_vm12, 1.0, %v3672_v1  ;;  %v2938_v54 = vld [vmem:[#allocation2 + $0x2a2] ss:$0 sm:$0xff]  ;;  %p3574_p9 = pnand %p3573_p6, %p3735_p5 }
  0x34   : > { %3146 = vmatprep.subr.mxu0 %v3672_v1  ;;  %p3581_p13 = por %p3580_p12, %p3579_p11 }
  0x35   : > { %3147 = vmatpush3.msra.mxu0 %v210_v12  ;;  %p3575_p10 = pneg %p3574_p9 }
  0x36   : > { %3148 = vmatprep.subr.mxu0 %v3672_v1 }
  0x37   : > { %3149 = vmatpush3.msra.mxu0 %v209_v13  ;;  %p3582_p0 = pnand %p3581_p13, %p3575_p10 }
  0x38   : > { %3150 = vmatprep.subr.mxu0 %v3672_v1 }
  0x39   : > { %3151 = vmatpush3.msra.mxu0 %v208_v14 }
  0x3a   : > { %3152 = vmatprep.subr.mxu0 %v3672_v1 }
  0x3b   : > { %3153 = vmatpush3.msra.mxu0 %v207_v15 }
  0x3c   : > { %3154 = vmatprep.subr.mxu0 %v3672_v1 }
  0x3d   : > { %3155 = vmatpush3.msra.mxu0 %v206_v16 }
  0x3e   : > { %3156 = vmatprep.subr.mxu0 %v3672_v1 }
  0x3f   : > { %3157 = vmatpush3.msra.mxu0 %v205_v17 }
  0x40   : > { %3158 = vmatprep.subr.mxu0 %v3672_v1 }
  0x41   : > { %3159 = vmatpush3.msra.mxu0 %v204_v18 }
  0x42   : > { %3160 = vmatprep.subr.mxu0 %v3672_v1 }
  0x43   : > { %3161 = vmatpush3.msra.mxu0 %v203_v19 }
  0x44   : > { %3162 = vmatprep.subr.mxu0 %v3672_v1 }
  0x45   : > { %3163 = vmatpush3.msra.mxu0 %v202_v20 }
  0x46   : > { %3164 = vmatprep.subr.mxu0 %v3672_v1 }
  0x47   : > { %3165 = vmatpush3.msra.mxu0 %v201_v21 }
  0x48   : > { %3222 = vmatprep.subr.mxu0 %v3672_v1 }
  0xa8   : > { %v197_v24 = vpop.permute.xlu0 %196 }
  0xa9   : > { %vm198_vm1 = vcmp.eq.s32.totalorder %v197_v24, %v3793_v23 }
  0xaa   : > { %3167 = vmatmul.mubr.msk.f32.vlgmr.msra.gmra.mxu0 %vm198_vm1, %v3674_v25 }
  0xab   : > { %3224 = vmatprep.mubr.msk.f32.mxu0 %vm3673_vm0, %v3672_v1 }
 0x16a   : > { %v284_v28 = vpop.f32.mrf.mxu0 }
 0x16b   : > { %v3799_v29 = vadd.f32 %v284_v28, %v217_v27 }
 0x16c   : > { %v3168_v31 = vpop.f32.mrf.mxu0 }
 0x16d   : > { %3178 = vmatmul.mubr.msk.f32.vlgmr.msra.gmra.mxu1 %vm358_vm2, %v3799_v29 }
 0x16e   : > { %3181 = vmatpush3.msra.mxu1 %v315_v30  ;;  %3188 = vmatprep.mubr.msk.f32.mxu1 %vm3673_vm0, %v3672_v1 }
 0x16f   : > { %3182 = vmatprep.subr.mxu1 %v3672_v1 }
 0x170   : > { %3183 = vmatpush3.msra.mxu1 %v314_v32 }
 0x171   : > { %3184 = vmatprep.subr.mxu1 %v3672_v1 }
 0x172   : > { %3185 = vmatpush3.msra.mxu1 %v313_v33 }
 0x173   : > { %3186 = vmatprep.subr.mxu1 %v3672_v1 }
 0x174   : > { %3187 = vmatpush3.msra.mxu1 %v312_v34 }
 0x175   : > { %3189 = vmatmul.mubr.msk.f32.vlgmr.msra.gmra.mxu1 %vm358_vm2, %v3799_v29  ;;  %3191 = vmatprep.subr.mxu1 %v3672_v1 }
 0x176   : > { %3192 = vmatpush3.msra.mxu1 %v319_v35  ;;  %3199 = vmatprep.mubr.msk.f32.mxu1 %vm3673_vm0, %v3672_v1 }
 0x177   : > { %3193 = vmatprep.subr.mxu1 %v3672_v1 }
 0x178   : > { %3194 = vmatpush3.msra.mxu1 %v318_v36 }
 0x179   : > { %3195 = vmatprep.subr.mxu1 %v3672_v1 }
 0x17a   : > { %3196 = vmatpush3.msra.mxu1 %v317_v37 }
 0x17b   : > { %3197 = vmatprep.subr.mxu1 %v3672_v1 }
 0x17c   : > { %3198 = vmatpush3.msra.mxu1 %v316_v38 }
 0x17d   : > { %3200 = vmatmul.mubr.msk.f32.vlgmr.msra.gmra.mxu1 %vm358_vm2, %v3799_v29  ;;  %3202 = vmatprep.subr.mxu1 %v3672_v1 }
 0x17e   : > { %3204 = vmatprep.mubr.msk.f32.mxu1 %vm3673_vm0, %v3672_v1 }
 0x22d   : > { %v428_v39 = vpop.f32.mrf.mxu1 }
 0x22e   : > { %v429_v42 = vadd.f32 %v2934_v40, %v428_v39 }
 0x22f   : > { %v3179_v41 = vpop.f32.mrf.mxu1 }
 0x230   : > { %v580_v44 = vmul.f32 0.35355338, %v429_v42 }
 0x232   : > { %v581_v50 = vmul.f32 %v3829_v46, %v580_v44  ;;  %v903_v51 = vmul.f32 %v3832_v47, %v580_v44  ;;  %v671_v55 = vmul.f32 %v3841_v52, %v580_v44  ;;  %v1063_v56 = vmul.f32 %v3844_v53, %v580_v44 }
 0x235   : > { %v502_v45 = vpop.f32.mrf.mxu1 }
 0x236   : > { %v503_v48 = vadd.f32 %v2936_v43, %v502_v45 }
 0x237   : > { %v3190_v49 = vpop.f32.mrf.mxu1 }
 0x238   : > { %3203 = vmatpush3.xpose.msk.msra.mxu1 %vm358_vm2, %v503_v48  ;;  %3223 = vmatpush3.xpose.msk.msra.mxu0 %vm358_vm2, %v503_v48  ;;  %v322_v49 = vld [vmem:[#allocation2 + $0x1f0] sm:$0xff] }
 0x239   : > { %3207 = vmatprep.subr.mxu1 %v3672_v1  ;;  %3232 = vmatprep.subr.mxu0 %v3672_v1 }
 0x23b   : > { %3205 = vmatmul.mubr.msk.f32.vlgmr.msra.gmra.mxu1 %vm358_vm2, %v581_v50  ;;  %3225 = vmatmul.mubr.msk.f32.vlgmr.msra.gmra.mxu0 %vm358_vm2, %v903_v51  ;;  %v321_v50 = vld [vmem:[#allocation2 + $0x1e8] sm:$0xff]  ;;  %v320_v51 = vld [vmem:[#allocation2 + $0x1e0] sm:$0xff] }
 0x23c   : > { %3208 = vmatpush3.xpose.msk.msra.mxu1 %vm358_vm2, %v503_v48  ;;  %3233 = vmatpush3.xpose.msk.msra.mxu0 %vm358_vm2, %v503_v48  ;;  %v323_v48 = vld [vmem:[#allocation2 + $0x1f8] sm:$0xff] }
 0x23d   : > { %v576_v57 = vpop.f32.mrf.mxu1  ;;  %3209 = vmatprep.mubr.msk.f32.mxu1 %vm3673_vm0, %v3672_v1  ;;  %3234 = vmatprep.mubr.msk.f32.mxu0 %vm3673_vm0, %v3672_v1 }
 0x23e   : > { %v3856_v58 = vadd.f32 %v2938_v54, %v576_v57  ;;  %3212 = vmatprep.subr.mxu1 %v3672_v1  ;;  %3264 = vmatprep.subr.mxu0 %v3672_v1 }
 0x23f   : > { %v3201_v59 = vpop.f32.mrf.mxu1  ;;  %3210 = vmatmul.mubr.msk.f32.vlgmr.msra.gmra.mxu1 %vm358_vm2, %v671_v55  ;;  %3235 = vmatmul.mubr.msk.f32.vlgmr.msra.gmra.mxu0 %vm358_vm2, %v1063_v56 }
 0x240   : > { %v756_v60 = vmul.f32 %v3841_v52, %v3856_v58  ;;  %3214 = vmatprep.mubr.msk.f32.mxu1 %vm3673_vm0, %v3672_v1  ;;  %3296 = vmatprep.mubr.msk.f32.mxu0 %vm3673_vm0, %v3672_v1  ;;  %v670_v37 = vmul.f32 %v3829_v46, %v3856_v58  ;;  %v988_v40 = vmul.f32 %v3832_v47, %v3856_v58 }
 0x241   : > { %v1148_v43 = vmul.f32 %v3844_v53, %v3856_v58 }
 0x242   : > { %3213 = vmatpush3.msra.mxu1 %v756_v60 }
 0x243   : > { %3217 = vmatprep.subr.mxu1 %v3672_v1 }
 0x2fb   : > { %v654_v61 = vpop.f32.mrf.mxu1  ;;  %v973_v62 = vpop.f32.mrf.mxu0 }
 0x2fc   : > { %v659_v63 = vsel %vm658_vm13, %v654_v61, -inf  ;;  %v977_v6 = vsel %vm658_vm13, %v973_v62, -inf }
 0x2fd   : > { %660 = vmax.xlane.f32.xlu1 %v659_v63  ;;  %v3206_v0 = vpop.f32.mrf.mxu1  ;;  %v3226_v2 = vpop.f32.mrf.mxu0 }
 0x2fe   : > { %v2952_v2 = vld [vmem:[#allocation2 + $0x2a3] ss:$0 sm:$0xff] }
 0x2ff   : > { %v741_v3 = vpop.f32.mrf.mxu1  ;;  %v1133_v4 = vpop.f32.mrf.mxu0 }
 0x300   : > { %v745_v5 = vsel %vm658_vm13, %v741_v3, -inf  ;;  %v1137_v9 = vsel %vm658_vm13, %v1133_v4, -inf }
 0x301   : > { %746 = vmax.xlane.f32.xlu0 %v745_v5  ;;  %v3211_v7 = vpop.f32.mrf.mxu1  ;;  %978 = vmax.xlane.f32.xlu1 %v977_v6  ;;  %v3236_v8 = vpop.f32.mrf.mxu0 }
 0x305   : > { %1138 = vmax.xlane.f32.xlu1 %v1137_v9 }
 0x386   : > { %v661_v10 = vpop.xlane.xlu1 %660 }
 0x387   : > { %v662_v11 = vsub.f32 %v654_v61, %v661_v10 }
 0x389   : > { %v663_v15 = vmul.f32 1.442695, %v662_v11 }
 0x38a   : > { %v747_v12 = vpop.xlane.xlu0 %746  ;;  %v979_v13 = vpop.xlane.xlu1 %978 }
 0x38b   : > { %v748_v14 = vsub.f32 %v741_v3, %v747_v12  ;;  %v980_v17 = vsub.f32 %v973_v62, %v979_v13  ;;  %v327_v13 = vld [vmem:[#allocation2 + $0x218] sm:$0xff] }
 0x38d   : > { %v749_v16 = vmul.f32 1.442695, %v748_v14  ;;  %v981_v19 = vmul.f32 1.442695, %v980_v17  ;;  %v326_v14 = vld [vmem:[#allocation2 + $0x210] sm:$0xff] }
 0x38e   : > { %v1139_v18 = vpop.xlane.xlu1 %1138  ;;  %v342_v17 = vld [vmem:[#allocation2 + $0x290] sm:$0xff] }
 0x38f   : > { %3502 = vpow2.f32 %v749_v16  ;;  %v1140_v20 = vsub.f32 %v1133_v4, %v1139_v18  ;;  %v343_v16 = vld [vmem:[#allocation2 + $0x298] sm:$0xff]  ;;  %v341_v18 = vld [vmem:[#allocation2 + $0x288] sm:$0xff] }
 0x390   : > { %3504 = vpow2.f32 %v663_v15  ;;  %v325_v15 = vld [vmem:[#allocation2 + $0x208] sm:$0xff]  ;;  %3265 = vmatpush3.msra.mxu0 %v343_v16  ;;  %v1511_v16 = vld [vmem:[#allocation2 + $0x2e0] sm:$0xff] }
 0x391   : > { %3506 = vpow2.f32 %v981_v19  ;;  %v1141_v21 = vmul.f32 1.442695, %v1140_v20  ;;  %3266 = vmatprep.subr.mxu0 %v3672_v1  ;;  %v340_v19 = vld [vmem:[#allocation2 + $0x280] sm:$0xff] }
 0x392   : > { %3267 = vmatpush3.msra.mxu0 %v342_v17  ;;  %v1510_v17 = vld [vmem:[#allocation2 + $0x2d8] sm:$0xff] }
 0x393   : > { %3508 = vpow2.f32 %v1141_v21  ;;  %3268 = vmatprep.subr.mxu0 %v3672_v1 }
 0x394   : > { %3269 = vmatpush3.msra.mxu0 %v341_v18  ;;  %v1509_v18 = vld [vmem:[#allocation2 + $0x2d0] sm:$0xff] }
 0x395   : > { %3270 = vmatprep.subr.mxu0 %v3672_v1 }
 0x396   : > { %3271 = vmatpush3.msra.mxu0 %v340_v19  ;;  %v1516_v19 = vld [vmem:[#allocation2 + $0x308] sm:$0xff] }
 0x397   : > { %3272 = vmatprep.subr.mxu0 %v3672_v1 }
 0x39c   : > { %v3503_v22 = vpop.eup %3502 }
 0x39d   : > { %v751_v23 = vsel %vm658_vm13, %v3503_v22, 0.0  ;;  %v3505_v24 = vpop.eup %3504 }
 0x39e   : > { %752 = vadd.xlane.f32.xlu1 %v751_v23  ;;  %v665_v25 = vsel %vm658_vm13, %v3505_v24, 0.0  ;;  %v3507_v26 = vpop.eup %3506 }
 0x39f   : > { %v983_v27 = vsel %vm658_vm13, %v3507_v26, 0.0 }
 0x3a0   : > { %v3509_v28 = vpop.eup %3508 }
 0x3a1   : > { %v1143_v30 = vsel %vm658_vm13, %v3509_v28, 0.0 }
 0x3a2   : > { %666 = vadd.xlane.f32.xlu1 %v665_v25 }
 0x3a6   : > { %984 = vadd.xlane.f32.xlu1 %v983_v27 }
 0x3aa   : > { %1144 = vadd.xlane.f32.xlu1 %v1143_v30  ;;  %v339_v30 = vld [vmem:[#allocation2 + $0x278] sm:$0xff] }
 0x3ab   : > { %3273 = vmatpush3.msra.mxu0 %v339_v30 }
 0x3ac   : > { %3274 = vmatprep.subr.mxu0 %v3672_v1 }
 0x427   : > { %v753_v31 = vpop.xlane.xlu1 %752 }
 0x428   : > { %3510 = vrcp.f32 %v753_v31  ;;  %v338_v31 = vld [vmem:[#allocation2 + $0x270] sm:$0xff] }
 0x429   : > { %3275 = vmatpush3.msra.mxu0 %v338_v31 }
 0x42a   : > { %3276 = vmatprep.subr.mxu0 %v3672_v1 }
 0x42b   : > { %v667_v32 = vpop.xlane.xlu1 %666 }
 0x42c   : > { %3512 = vrcp.f32 %v667_v32  ;;  %v337_v32 = vld [vmem:[#allocation2 + $0x268] sm:$0xff] }
 0x42d   : > { %3277 = vmatpush3.msra.mxu0 %v337_v32 }
 0x42e   : > { %3278 = vmatprep.subr.mxu0 %v3672_v1 }
 0x42f   : > { %v985_v33 = vpop.xlane.xlu1 %984 }
 0x430   : > { %3514 = vrcp.f32 %v985_v33  ;;  %v336_v33 = vld [vmem:[#allocation2 + $0x260] sm:$0xff] }
 0x431   : > { %3279 = vmatpush3.msra.mxu0 %v336_v33 }
 0x432   : > { %3280 = vmatprep.subr.mxu0 %v3672_v1 }
 0x433   : > { %v1145_v34 = vpop.xlane.xlu1 %1144 }
 0x434   : > { %3516 = vrcp.f32 %v1145_v34  ;;  %v335_v34 = vld [vmem:[#allocation2 + $0x258] sm:$0xff] }
 0x435   : > { %v3511_v35 = vpop.eup %3510  ;;  %3281 = vmatpush3.msra.mxu0 %v335_v34  ;;  %v2965_v34 = vld [vmem:[#allocation2 + $0x3d2] ss:$0 sm:$0xff] }
 0x436   : > { %v755_v36 = vmul.f32 %v3511_v35, %v3503_v22  ;;  %3282 = vmatprep.subr.mxu0 %v3672_v1  ;;  %v334_v35 = vld [vmem:[#allocation2 + $0x250] sm:$0xff] }
 0x437   : > { %3283 = vmatpush3.msra.mxu0 %v334_v35 }
 0x438   : > { %3215 = vmatmul.mubr.msk.f32.vlgmr.msra.gmra.mxu1 %vm658_vm13, %v755_v36  ;;  %3284 = vmatprep.subr.mxu0 %v3672_v1  ;;  %v333_v36 = vld [vmem:[#allocation2 + $0x248] sm:$0xff] }
 0x439   : > { %v3513_v38 = vpop.eup %3512  ;;  %3218 = vmatpush3.msra.mxu1 %v670_v37  ;;  %3219 = vmatprep.mubr.msk.f32.mxu1 %vm3673_vm0, %v3672_v1  ;;  %v332_v37 = vld [vmem:[#allocation2 + $0x240] sm:$0xff] }
 0x43a   : > { %3227 = vmatprep.subr.mxu1 %v3672_v1  ;;  %v669_v39 = vmul.f32 %v3513_v38, %v3505_v24  ;;  %v2954_v24 = vld [vmem:[#allocation2 + $0x2a4] ss:$0 sm:$0xff]  ;;  %3285 = vmatpush3.msra.mxu0 %v333_v36  ;;  %v331_v38 = vld [vmem:[#allocation2 + $0x238] sm:$0xff] }
 0x43b   : > { %3286 = vmatprep.subr.mxu0 %v3672_v1 }
 0x43c   : > { %3220 = vmatmul.mubr.msk.f32.vlgmr.msra.gmra.mxu1 %vm658_vm13, %v669_v39  ;;  %3287 = vmatpush3.msra.mxu0 %v332_v37  ;;  %v330_v39 = vld [vmem:[#allocation2 + $0x230] sm:$0xff] }
 0x43d   : > { %v3515_v41 = vpop.eup %3514  ;;  %3228 = vmatpush3.msra.mxu1 %v988_v40  ;;  %3229 = vmatprep.mubr.msk.f32.mxu1 %vm3673_vm0, %v3672_v1  ;;  %v329_v40 = vld [vmem:[#allocation2 + $0x228] sm:$0xff] }
 0x43e   : > { %3237 = vmatprep.subr.mxu1 %v3672_v1  ;;  %v987_v42 = vmul.f32 %v3515_v41, %v3507_v26  ;;  %v2955_v26 = vld [vmem:[#allocation2 + $0x2a5] ss:$0 sm:$0xff]  ;;  %3288 = vmatprep.subr.mxu0 %v3672_v1 }
 0x43f   : > { %3289 = vmatpush3.msra.mxu0 %v331_v38  ;;  %v328_v41 = vld [vmem:[#allocation2 + $0x220] sm:$0xff] }
 0x440   : > { %3230 = vmatmul.mubr.msk.f32.vlgmr.msra.gmra.mxu1 %vm658_vm13, %v987_v42  ;;  %3290 = vmatprep.subr.mxu0 %v3672_v1  ;;  %v2956_v42 = vld [vmem:[#allocation2 + $0x2a6] ss:$0 sm:$0xff] }
 0x441   : > { %v3517_v44 = vpop.eup %3516  ;;  %3238 = vmatpush3.msra.mxu1 %v1148_v43  ;;  %3239 = vmatprep.mubr.msk.f32.mxu1 %vm3673_vm0, %v3672_v1 }
 0x442   : > { %v1147_v45 = vmul.f32 %v3517_v44, %v3509_v28  ;;  %3242 = vmatprep.subr.mxu1 %v3672_v1  ;;  %3291 = vmatpush3.msra.mxu0 %v330_v39 }
 0x443   : > { %3292 = vmatprep.subr.mxu0 %v3672_v1 }
 0x444   : > { %3240 = vmatmul.mubr.msk.f32.vlgmr.msra.gmra.mxu1 %vm658_vm13, %v1147_v45  ;;  %3293 = vmatpush3.msra.mxu0 %v329_v40 }
 0x445   : > { %3250 = vmatprep.mubr.msk.f32.mxu1 %vm3673_vm0, %v3672_v1  ;;  %3243 = vmatpush3.msra.mxu1 %v323_v48 }
 0x446   : > { %3244 = vmatprep.subr.mxu1 %v3672_v1  ;;  %3294 = vmatprep.subr.mxu0 %v3672_v1 }
 0x447   : > { %3245 = vmatpush3.msra.mxu1 %v322_v49  ;;  %3295 = vmatpush3.msra.mxu0 %v328_v41 }
 0x448   : > { %3246 = vmatprep.subr.mxu1 %v3672_v1  ;;  %3342 = vmatprep.subr.mxu0 %v3672_v1 }
 0x449   : > { %3247 = vmatpush3.msra.mxu1 %v321_v50 }
 0x44a   : > { %3248 = vmatprep.subr.mxu1 %v3672_v1 }
 0x44b   : > { %3249 = vmatpush3.msra.mxu1 %v320_v51 }
 0x44c   : > { %3253 = vmatprep.subr.mxu1 %v3672_v1 }
 0x4f8   : > { %v826_v54 = vpop.f32.mrf.mxu1 }
 0x4fa   : > { %v3216_v55 = vpop.f32.mrf.mxu1 }
 0x4fb   : > { %v2958_v55 = vld [vmem:[#allocation2 + $0x2a7] ss:$0 sm:$0xff] }
 0x4fc   : > { %v899_v56 = vpop.f32.mrf.mxu1 }
 0x4fd   : > { %v900_v59 = vadd.f32 %v899_v56, %v826_v54 }
 0x4fe   : > { %v3221_v57 = vpop.f32.mrf.mxu1 }
 0x500   : > { %v1058_v58 = vpop.f32.mrf.mxu1 }
 0x501   : > { %v1062_v61 = vadd.f32 %v1058_v58, %v900_v59 }
 0x502   : > { %v3231_v60 = vpop.f32.mrf.mxu1 }
 0x504   : > { %v1218_v62 = vpop.f32.mrf.mxu1 }
 0x505   : > { %v1222_v63 = vadd.f32 %v1218_v62, %v1062_v61 }
 0x506   : > { %v3241_v0 = vpop.f32.mrf.mxu1 }
 0x507   : > { %3251 = vmatmul.mubr.msk.f32.vlgmr.msra.gmra.mxu1 %vm358_vm2, %v1222_v63 }
 0x508   : > { %3261 = vmatprep.mubr.msk.f32.mxu1 %vm3673_vm0, %v3672_v1  ;;  %3254 = vmatpush3.msra.mxu1 %v327_v13  ;;  %v2960_v13 = vld [vmem:[#allocation2 + $0x2a9] ss:$0 sm:$0xff] }
 0x509   : > { %3255 = vmatprep.subr.mxu1 %v3672_v1 }
 0x50a   : > { %3256 = vmatpush3.msra.mxu1 %v326_v14 }
 0x50b   : > { %3257 = vmatprep.subr.mxu1 %v3672_v1 }
 0x50c   : > { %3258 = vmatpush3.msra.mxu1 %v325_v15 }
 0x50d   : > { %3259 = vmatprep.subr.mxu1 %v3672_v1 }
 0x5c7   : > { %v1296_v3 = vpop.f32.mrf.mxu1 }
 0x5c8   : > { %v1297_v4 = vadd.f32 %v2952_v2, %v1296_v3  ;;  %v1508_v3 = vld [vmem:[#allocation2 + $0x2c8] sm:$0xff] }
 0x5c9   : > { %v3252_v5 = vpop.f32.mrf.mxu1 }
 0x5ca   : > { %v1300_v6 = vadd.f32 %v1297_v4, %v3799_v29  ;;  %v324_v29 = vld [vmem:[#allocation2 + $0x200] sm:$0xff]  ;;  %v1506_v5 = vld [vmem:[#allocation2 + $0x2b8] sm:$0xff] }
 0x5cb   : > { %3260 = vmatpush3.msra.mxu1 %v324_v29  ;;  %v1507_v4 = vld [vmem:[#allocation2 + $0x2c0] sm:$0xff]  ;;  %v1512_v29 = vld [vmem:[#allocation2 + $0x2e8] sm:$0xff] }
 0x5cc   : > { %v1301_v7 = vsel %vm358_vm2, %v1300_v6, 0.0  ;;  %3299 = vmatprep.subr.mxu1 %v3672_v1 }
 0x5cd   : > { %1302 = vadd.xlane.f32.xlu1 %v1301_v7 }
 0x656   : > { %v1303_v8 = vpop.xlane.xlu1 %1302 }
 0x657   : > { %v1305_v9 = vmul.f32 0.03125, %v1303_v8 }
 0x659   : > { %v1306_v10 = vsub.f32 %v1300_v6, %v1305_v9  ;;  %v1505_v6 = vld [vmem:[#allocation2 + $0x2b0] sm:$0xff] }
 0x65b   : > { %v1307_v11 = vmul.f32 %v1306_v10, %v1306_v10 }
 0x65d   : > { %v1308_v12 = vsel %vm358_vm2, %v1307_v11, 0.0  ;;  %v2959_v11 = vld [vmem:[#allocation2 + $0x2a8] ss:$0 sm:$0xff] }
 0x65e   : > { %1309 = vadd.xlane.f32.xlu1 %v1308_v12 }
 0x6e7   : > { %v1310_v20 = vpop.xlane.xlu1 %1309 }
 0x6e8   : > { %v1311_v21 = vmul.f32 0.03125, %v1310_v20  ;;  %v1515_v20 = vld [vmem:[#allocation2 + $0x300] sm:$0xff] }
 0x6ea   : > { %v1312_v22 = vadd.f32 1e-05, %v1311_v21  ;;  %v1514_v21 = vld [vmem:[#allocation2 + $0x2f8] sm:$0xff] }
 0x6ec   : > { %3518 = vrsqrt.f32 %v1312_v22  ;;  %v1513_v22 = vld [vmem:[#allocation2 + $0x2f0] sm:$0xff] }
 0x6f9   : > { %v3519_v23 = vpop.eup %3518 }
 0x6fa   : > { %v1314_v25 = vmul.f32 %v3519_v23, %v1306_v10 }
 0x6fc   : > { %v1319_v27 = vmul.f32 %v2954_v24, %v1314_v25  ;;  %v2961_v24 = vld [vmem:[#allocation2 + $0x3d0] ss:$0 sm:$0xff] }
 0x6fe   : > { %v1324_v28 = vadd.f32 %v2955_v26, %v1319_v27  ;;  %v2963_v27 = vld [vmem:[#allocation2 + $0x3d1] ss:$0 sm:$0xff] }
 0x700   : > { %3262 = vmatmul.mubr.msk.f32.vlgmr.msra.gmra.mxu1 %vm358_vm2, %v1324_v28 }
 0x701   : > { %3307 = vmatprep.mubr.msk.f32.mxu1 %vm3673_vm0, %v3672_v1  ;;  %3300 = vmatpush3.msra.mxu1 %v1508_v3 }
 0x702   : > { %3301 = vmatprep.subr.mxu1 %v3672_v1 }
 0x703   : > { %3302 = vmatpush3.msra.mxu1 %v1507_v4 }
 0x704   : > { %3303 = vmatprep.subr.mxu1 %v3672_v1 }
 0x705   : > { %3304 = vmatpush3.msra.mxu1 %v1506_v5 }
 0x706   : > { %3305 = vmatprep.subr.mxu1 %v3672_v1 }
 0x707   : > { %3306 = vmatpush3.msra.mxu1 %v1505_v6 }
 0x708   : > { %3310 = vmatprep.subr.mxu1 %v3672_v1 }
 0x7c0   : > { %v1398_v43 = vpop.f32.mrf.mxu1 }
 0x7c1   : > { %v1399_v44 = vadd.f32 %v2956_v42, %v1398_v43 }
 0x7c2   : > { %v3263_v45 = vpop.f32.mrf.mxu1 }
 0x7c3   : > { %v1403_v48 = vmul.f32 0.70710677, %v1399_v44  ;;  %v1402_v50 = vmul.f32 0.5, %v1399_v44 }
 0x7c5   : > { %3520 = verf.f32 %v1403_v48 }
 0x7d2   : > { %v3521_v49 = vpop.eup %3520 }
 0x7d3   : > { %v1405_v51 = vadd.f32 1.0, %v3521_v49 }
 0x7d5   : > { %v1406_v54 = vmul.f32 %v1405_v51, %v1402_v50 }
 0x7d7   : > { %3297 = vmatmul.mubr.f32.vlgmr.msra.gmra.mxu0 %v1406_v54 }
 0x7d8   : > { %3344 = vmatprep.mubr.msk.f32.mxu0 %vm3673_vm0, %v3672_v1 }
 0x897   : > { %v1477_v56 = vpop.f32.mrf.mxu0 }
 0x898   : > { %v1478_v57 = vadd.f32 %v2958_v55, %v1477_v56 }
 0x899   : > { %v3298_v58 = vpop.f32.mrf.mxu0 }
 0x89a   : > { %v1481_v59 = vadd.f32 %v1478_v57, %v1324_v28 }
 0x89c   : > { %v1482_v60 = vsel %vm358_vm2, %v1481_v59, 0.0 }
 0x89d   : > { %1483 = vadd.xlane.f32.xlu0 %v1482_v60 }
 0x926   : > { %v1484_v61 = vpop.xlane.xlu0 %1483 }
 0x927   : > { %v1485_v62 = vmul.f32 0.03125, %v1484_v61 }
 0x929   : > { %v1486_v63 = vsub.f32 %v1481_v59, %v1485_v62 }
 0x92b   : > { %v1487_v0 = vmul.f32 %v1486_v63, %v1486_v63 }
 0x92d   : > { %v1488_v2 = vsel %vm358_vm2, %v1487_v0, 0.0 }
 0x92e   : > { %1489 = vadd.xlane.f32.xlu1 %v1488_v2 }
 0x9b7   : > { %v1490_v7 = vpop.xlane.xlu1 %1489 }
 0x9b8   : > { %v1491_v8 = vmul.f32 0.03125, %v1490_v7 }
 0x9ba   : > { %v1492_v9 = vadd.f32 1e-05, %v1491_v8 }
 0x9bc   : > { %3522 = vrsqrt.f32 %v1492_v9 }
 0x9c9   : > { %v3523_v10 = vpop.eup %3522 }
 0x9ca   : > { %v1494_v12 = vmul.f32 %v3523_v10, %v1486_v63 }
 0x9cc   : > { %v1499_v14 = vmul.f32 %v2959_v11, %v1494_v12 }
 0x9ce   : > { %v3939_v15 = vadd.f32 %v2960_v13, %v1499_v14 }
 0x9d0   : > { %3308 = vmatmul.mubr.msk.f32.vlgmr.msra.gmra.mxu1 %vm358_vm2, %v3939_v15 }
 0x9d1   : > { %3311 = vmatpush3.msra.mxu1 %v1512_v29  ;;  %3318 = vmatprep.mubr.msk.f32.mxu1 %vm3673_vm0, %v3672_v1 }
 0x9d2   : > { %3312 = vmatprep.subr.mxu1 %v3672_v1 }
 0x9d3   : > { %3313 = vmatpush3.msra.mxu1 %v1511_v16 }
 0x9d4   : > { %3314 = vmatprep.subr.mxu1 %v3672_v1 }
 0x9d5   : > { %3315 = vmatpush3.msra.mxu1 %v1510_v17 }
 0x9d6   : > { %3316 = vmatprep.subr.mxu1 %v3672_v1 }
 0x9d7   : > { %3317 = vmatpush3.msra.mxu1 %v1509_v18 }
 0x9d8   : > { %3319 = vmatmul.mubr.msk.f32.vlgmr.msra.gmra.mxu1 %vm358_vm2, %v3939_v15  ;;  %3321 = vmatprep.subr.mxu1 %v3672_v1 }
 0x9d9   : > { %3322 = vmatpush3.msra.mxu1 %v1516_v19  ;;  %3329 = vmatprep.mubr.msk.f32.mxu1 %vm3673_vm0, %v3672_v1 }
 0x9da   : > { %3323 = vmatprep.subr.mxu1 %v3672_v1 }
 0x9db   : > { %3324 = vmatpush3.msra.mxu1 %v1515_v20 }
 0x9dc   : > { %3325 = vmatprep.subr.mxu1 %v3672_v1 }
 0x9dd   : > { %3326 = vmatpush3.msra.mxu1 %v1514_v21 }
 0x9de   : > { %3327 = vmatprep.subr.mxu1 %v3672_v1 }
 0x9df   : > { %3328 = vmatpush3.msra.mxu1 %v1513_v22 }
 0x9e0   : > { %3330 = vmatmul.mubr.msk.f32.vlgmr.msra.gmra.mxu1 %vm358_vm2, %v3939_v15  ;;  %3332 = vmatprep.subr.mxu1 %v3672_v1 }
 0x9e1   : > { %3334 = vmatprep.mubr.msk.f32.mxu1 %vm3673_vm0, %v3672_v1 }
 0xa90   : > { %v1624_v23 = vpop.f32.mrf.mxu1 }
 0xa91   : > { %v1625_v26 = vadd.f32 %v2961_v24, %v1624_v23 }
 0xa92   : > { %v3309_v25 = vpop.f32.mrf.mxu1 }
 0xa93   : > { %v1776_v28 = vmul.f32 0.35355338, %v1625_v26 }
 0xa95   : > { %v1777_v33 = vmul.f32 %v3829_v46, %v1776_v28  ;;  %v1866_v35 = vmul.f32 %v3841_v52, %v1776_v28  ;;  %v2098_v57 = vmul.f32 %v3832_v47, %v1776_v28  ;;  %v2258_v58 = vmul.f32 %v3844_v53, %v1776_v28 }
 0xa98   : > { %v1698_v30 = vpop.f32.mrf.mxu1 }
 0xa99   : > { %v1699_v31 = vadd.f32 %v2963_v27, %v1698_v30 }
 0xa9a   : > { %v3320_v32 = vpop.f32.mrf.mxu1 }
 0xa9b   : > { %3333 = vmatpush3.xpose.msk.msra.mxu1 %vm358_vm2, %v1699_v31  ;;  %v1520_v32 = vld [vmem:[#allocation2 + $0x328] sm:$0xff] }
 0xa9c   : > { %3337 = vmatprep.subr.mxu1 %v3672_v1 }
 0xa9e   : > { %3335 = vmatmul.mubr.msk.f32.vlgmr.msra.gmra.mxu1 %vm358_vm2, %v1777_v33  ;;  %v1518_v33 = vld [vmem:[#allocation2 + $0x318] sm:$0xff] }
 0xa9f   : > { %3338 = vmatpush3.xpose.msk.msra.mxu1 %vm358_vm2, %v1699_v31  ;;  %3339 = vmatprep.mubr.msk.f32.mxu1 %vm3673_vm0, %v3672_v1 }
 0xaa0   : > { %v1772_v36 = vpop.f32.mrf.mxu1  ;;  %3347 = vmatprep.subr.mxu1 %v3672_v1 }
 0xaa1   : > { %v3970_v37 = vadd.f32 %v2965_v34, %v1772_v36  ;;  %v1517_v34 = vld [vmem:[#allocation2 + $0x310] sm:$0xff] }
 0xaa2   : > { %v3331_v38 = vpop.f32.mrf.mxu1  ;;  %3340 = vmatmul.mubr.msk.f32.vlgmr.msra.gmra.mxu1 %vm358_vm2, %v1866_v35 }
 0xaa3   : > { %v1951_v39 = vmul.f32 %v3841_v52, %v3970_v37  ;;  %v1865_v40 = vmul.f32 %v3829_v46, %v3970_v37  ;;  %3349 = vmatprep.mubr.msk.f32.mxu1 %vm3673_vm0, %v3672_v1  ;;  %v2183_v20 = vmul.f32 %v3832_v47, %v3970_v37  ;;  %v2343_v47 = vmul.f32 %v3844_v53, %v3970_v37  ;;  %v1519_v53 = vld [vmem:[#allocation2 + $0x320] sm:$0xff] }
 0xaa5   : > { %3343 = vmatpush3.msra.mxu0 %v1951_v39  ;;  %3348 = vmatpush3.msra.mxu1 %v1865_v40 }
 0xaa6   : > { %3352 = vmatprep.subr.mxu0 %v3672_v1  ;;  %3357 = vmatprep.subr.mxu1 %v3672_v1 }
 0xb5e   : > { %v1850_v41 = vpop.f32.mrf.mxu1 }
 0xb5f   : > { %v1854_v52 = vsel %vm658_vm13, %v1850_v41, -inf }
 0xb60   : > { %v3336_v42 = vpop.f32.mrf.mxu1 }
 0xb61   : > { %v2979_v42 = vld [vmem:[#allocation2 + $0x3d3] ss:$0 sm:$0xff] }
 0xb62   : > { %v1936_v43 = vpop.f32.mrf.mxu1 }
 0xb63   : > { %v1940_v44 = vsel %vm658_vm13, %v1936_v43, -inf }
 0xb64   : > { %1941 = vmax.xlane.f32.xlu0 %v1940_v44  ;;  %v3341_v45 = vpop.f32.mrf.mxu1 }
 0xb68   : > { %1855 = vmax.xlane.f32.xlu0 %v1854_v52 }
 0xbed   : > { %v1942_v46 = vpop.xlane.xlu0 %1941 }
 0xbee   : > { %v1943_v48 = vsub.f32 %v1936_v43, %v1942_v46 }
 0xbf0   : > { %v1944_v49 = vmul.f32 1.442695, %v1943_v48 }
 0xbf1   : > { %v1856_v59 = vpop.xlane.xlu0 %1855 }
 0xbf2   : > { %3524 = vpow2.f32 %v1944_v49  ;;  %v1857_v60 = vsub.f32 %v1850_v41, %v1856_v59  ;;  %v1539_v59 = vld [vmem:[#allocation2 + $0x3c0] sm:$0xff] }
 0xbf4   : > { %v1858_v61 = vmul.f32 1.442695, %v1857_v60  ;;  %v1538_v60 = vld [vmem:[#allocation2 + $0x3b8] sm:$0xff] }
 0xbff   : > { %v3525_v50 = vpop.eup %3524 }
 0xc00   : > { %v1946_v51 = vsel %vm658_vm13, %v3525_v50, 0.0 }
 0xc01   : > { %1947 = vadd.xlane.f32.xlu1 %v1946_v51 }
 0xc8a   : > { %v1948_v54 = vpop.xlane.xlu1 %1947 }
 0xc8b   : > { %3526 = vrcp.f32 %v1948_v54 }
 0xc8c   : > { %3528 = vpow2.f32 %v1858_v61  ;;  %v1537_v61 = vld [vmem:[#allocation2 + $0x3b0] sm:$0xff] }
 0xc98   : > { %v3527_v55 = vpop.eup %3526 }
 0xc99   : > { %v1950_v56 = vmul.f32 %v3527_v55, %v3525_v50  ;;  %v3529_v3 = vpop.eup %3528  ;;  %v1524_v55 = vld [vmem:[#allocation2 + $0x348] sm:$0xff] }
 0xc9a   : > { %v1860_v6 = vsel %vm658_vm13, %v3529_v3, 0.0 }
 0xc9b   : > { %3345 = vmatmul.mubr.msk.f32.vlgmr.msra.gmra.mxu0 %vm658_vm13, %v1950_v56  ;;  %v1523_v56 = vld [vmem:[#allocation2 + $0x340] sm:$0xff] }
 0xc9c   : > { %3353 = vmatpush3.xpose.msk.msra.mxu0 %vm358_vm2, %v1699_v31  ;;  %3354 = vmatprep.mubr.msk.f32.mxu0 %vm3673_vm0, %v3672_v1 }
 0xc9d   : > { %3362 = vmatprep.subr.mxu0 %v3672_v1 }
 0xc9f   : > { %3355 = vmatmul.mubr.msk.f32.vlgmr.msra.gmra.mxu0 %vm358_vm2, %v2098_v57  ;;  %v1522_v57 = vld [vmem:[#allocation2 + $0x338] sm:$0xff] }
 0xca0   : > { %3363 = vmatpush3.xpose.msk.msra.mxu0 %vm358_vm2, %v1699_v31  ;;  %3364 = vmatprep.mubr.msk.f32.mxu0 %vm3673_vm0, %v3672_v1 }
 0xca1   : > { %3372 = vmatprep.subr.mxu0 %v3672_v1 }
 0xca3   : > { %3365 = vmatmul.mubr.msk.f32.vlgmr.msra.gmra.mxu0 %vm358_vm2, %v2258_v58  ;;  %v1540_v58 = vld [vmem:[#allocation2 + $0x3c8] sm:$0xff] }
 0xca4   : > { %3380 = vmatprep.mubr.msk.f32.mxu0 %vm3673_vm0, %v3672_v1  ;;  %3373 = vmatpush3.msra.mxu0 %v1520_v32 }
 0xca5   : > { %3374 = vmatprep.subr.mxu0 %v3672_v1 }
 0xca6   : > { %3375 = vmatpush3.msra.mxu0 %v1519_v53 }
 0xca7   : > { %3376 = vmatprep.subr.mxu0 %v3672_v1 }
 0xca8   : > { %3377 = vmatpush3.msra.mxu0 %v1518_v33 }
 0xca9   : > { %3378 = vmatprep.subr.mxu0 %v3672_v1 }
 0xcaa   : > { %3379 = vmatpush3.msra.mxu0 %v1517_v34 }
 0xcab   : > { %3394 = vmatprep.subr.mxu0 %v3672_v1 }
 0xd5b   : > { %v3999_v62 = vpop.f32.mrf.mxu0 }
 0xd5d   : > { %v3346_v63 = vpop.f32.mrf.mxu0 }
 0xd5f   : > { %v2168_v0 = vpop.f32.mrf.mxu0 }
 0xd60   : > { %v2172_v2 = vsel %vm658_vm13, %v2168_v0, -inf }
 0xd61   : > { %2173 = vmax.xlane.f32.xlu1 %v2172_v2  ;;  %v3356_v4 = vpop.f32.mrf.mxu0 }
 0xd63   : > { %v2328_v5 = vpop.f32.mrf.mxu0 }
 0xd64   : > { %v2332_v7 = vsel %vm658_vm13, %v2328_v5, -inf }
 0xd65   : > { %1861 = vadd.xlane.f32.xlu1 %v1860_v6  ;;  %2333 = vmax.xlane.f32.xlu0 %v2332_v7  ;;  %v3366_v8 = vpop.f32.mrf.mxu0 }
 0xd66   : > { %v1536_v8 = vld [vmem:[#allocation2 + $0x3a8] sm:$0xff] }
 0xdea   : > { %v2174_v9 = vpop.xlane.xlu1 %2173 }
 0xdeb   : > { %v2175_v10 = vsub.f32 %v2168_v0, %v2174_v9  ;;  %v1535_v9 = vld [vmem:[#allocation2 + $0x3a0] sm:$0xff] }
 0xded   : > { %v2176_v11 = vmul.f32 1.442695, %v2175_v10  ;;  %v1534_v10 = vld [vmem:[#allocation2 + $0x398] sm:$0xff] }
 0xdee   : > { %v1862_v12 = vpop.xlane.xlu1 %1861  ;;  %v2334_v13 = vpop.xlane.xlu0 %2333 }
 0xdef   : > { %3530 = vpow2.f32 %v2176_v11  ;;  %v2335_v14 = vsub.f32 %v2328_v5, %v2334_v13  ;;  %v2982_v5 = vld [vmem:[#allocation2 + $0x3d5] ss:$0 sm:$0xff]  ;;  %v1531_v13 = vld [vmem:[#allocation2 + $0x380] sm:$0xff] }
 0xdf0   : > { %3532 = vrcp.f32 %v1862_v12  ;;  %v1533_v11 = vld [vmem:[#allocation2 + $0x390] sm:$0xff]  ;;  %v1532_v12 = vld [vmem:[#allocation2 + $0x388] sm:$0xff] }
 0xdf1   : > { %v2336_v29 = vmul.f32 1.442695, %v2335_v14  ;;  %v1530_v14 = vld [vmem:[#allocation2 + $0x378] sm:$0xff] }
 0xdf3   : > { %3534 = vpow2.f32 %v2336_v29  ;;  %v1529_v29 = vld [vmem:[#allocation2 + $0x370] sm:$0xff] }
 0xdfc   : > { %v3531_v16 = vpop.eup %3530 }
 0xdfd   : > { %v3533_v17 = vpop.eup %3532  ;;  %v2178_v18 = vsel %vm658_vm13, %v3531_v16, 0.0 }
 0xdfe   : > { %2179 = vadd.xlane.f32.xlu0 %v2178_v18  ;;  %v1864_v19 = vmul.f32 %v3533_v17, %v3529_v3  ;;  %v2981_v3 = vld [vmem:[#allocation2 + $0x3d4] ss:$0 sm:$0xff]  ;;  %v1527_v17 = vld [vmem:[#allocation2 + $0x360] sm:$0xff]  ;;  %v1526_v18 = vld [vmem:[#allocation2 + $0x358] sm:$0xff] }
 0xe00   : > { %v3535_v21 = vpop.eup %3534  ;;  %3350 = vmatmul.mubr.msk.f32.vlgmr.msra.gmra.mxu1 %vm658_vm13, %v1864_v19  ;;  %v1525_v19 = vld [vmem:[#allocation2 + $0x350] sm:$0xff] }
 0xe01   : > { %3358 = vmatpush3.msra.mxu1 %v2183_v20  ;;  %v2338_v22 = vsel %vm658_vm13, %v3535_v21, 0.0  ;;  %3359 = vmatprep.mubr.msk.f32.mxu1 %vm3673_vm0, %v3672_v1  ;;  %v2983_v20 = vld [vmem:[#allocation2 + $0x3d6] ss:$0 sm:$0xff] }
 0xe02   : > { %2339 = vadd.xlane.f32.xlu1 %v2338_v22  ;;  %3367 = vmatprep.subr.mxu1 %v3672_v1 }
 0xe87   : > { %v2180_v23 = vpop.xlane.xlu0 %2179 }
 0xe88   : > { %3536 = vrcp.f32 %v2180_v23 }
 0xe8b   : > { %v2340_v24 = vpop.xlane.xlu1 %2339 }
 0xe8c   : > { %3538 = vrcp.f32 %v2340_v24 }
 0xe95   : > { %v3537_v25 = vpop.eup %3536 }
 0xe96   : > { %v2182_v26 = vmul.f32 %v3537_v25, %v3531_v16  ;;  %v1528_v16 = vld [vmem:[#allocation2 + $0x368] sm:$0xff] }
 0xe98   : > { %3360 = vmatmul.mubr.msk.f32.vlgmr.msra.gmra.mxu1 %vm658_vm13, %v2182_v26 }
 0xe99   : > { %v3539_v27 = vpop.eup %3538  ;;  %3368 = vmatpush3.msra.mxu1 %v2343_v47  ;;  %3369 = vmatprep.mubr.msk.f32.mxu1 %vm3673_vm0, %v3672_v1 }
 0xe9a   : > { %v2342_v28 = vmul.f32 %v3539_v27, %v3535_v21  ;;  %3383 = vmatprep.subr.mxu1 %v3672_v1 }
 0xe9c   : > { %3370 = vmatmul.mubr.msk.f32.vlgmr.msra.gmra.mxu1 %vm658_vm13, %v2342_v28  ;;  %v2985_v28 = vld [vmem:[#allocation2 + $0x3d7] ss:$0 sm:$0xff] }
 0xe9d   : > { %3391 = vmatprep.mubr.msk.f32.mxu1 %vm3673_vm0, %v3672_v1  ;;  %3384 = vmatpush3.msra.mxu1 %v1524_v55 }
 0xe9e   : > { %3385 = vmatprep.subr.mxu1 %v3672_v1 }
 0xe9f   : > { %3386 = vmatpush3.msra.mxu1 %v1523_v56 }
 0xea0   : > { %3387 = vmatprep.subr.mxu1 %v3672_v1 }
 0xea1   : > { %3388 = vmatpush3.msra.mxu1 %v1522_v57 }
 0xea2   : > { %3389 = vmatprep.subr.mxu1 %v3672_v1 }
 0xec0   : > { %v2094_v30 = vpop.f32.mrf.mxu1 }
 0xec1   : > { %v2095_v36 = vadd.f32 %v2094_v30, %v3999_v62 }
 0xec2   : > { %v3351_v31 = vpop.f32.mrf.mxu1 }
 0xf58   : > { %v2253_v35 = vpop.f32.mrf.mxu1 }
 0xf59   : > { %v2257_v38 = vadd.f32 %v2253_v35, %v2095_v36 }
 0xf5a   : > { %v3361_v37 = vpop.f32.mrf.mxu1 }
 0xf5c   : > { %v2413_v39 = vpop.f32.mrf.mxu1 }
 0xf5d   : > { %v2417_v40 = vadd.f32 %v2413_v39, %v2257_v38  ;;  %v2702_v39 = vld [vmem:[#allocation2 + $0x170] sm:$0xff] }
 0xf5e   : > { %v3371_v41 = vpop.f32.mrf.mxu1 }
 0xf5f   : > { %3381 = vmatmul.mubr.msk.f32.vlgmr.msra.gmra.mxu0 %vm358_vm2, %v2417_v40  ;;  %v2701_v40 = vld [vmem:[#allocation2 + $0x168] sm:$0xff]  ;;  %v2700_v41 = vld [vmem:[#allocation2 + $0x160] sm:$0xff] }
 0xf60   : > { %3426 = vmatprep.mubr.msk.f32.mxu0 %vm3673_vm0, %v3672_v1  ;;  %3395 = vmatpush3.msra.mxu0 %v1540_v58 }
 0xf61   : > { %3396 = vmatprep.subr.mxu0 %v3672_v1 }
 0xf62   : > { %3397 = vmatpush3.msra.mxu0 %v1539_v59 }
 0xf63   : > { %3398 = vmatprep.subr.mxu0 %v3672_v1 }
 0xf64   : > { %3399 = vmatpush3.msra.mxu0 %v1538_v60 }
 0xf65   : > { %3400 = vmatprep.subr.mxu0 %v3672_v1 }
 0xf66   : > { %3401 = vmatpush3.msra.mxu0 %v1537_v61 }
 0xf67   : > { %3402 = vmatprep.subr.mxu0 %v3672_v1 }
 0xf68   : > { %3403 = vmatpush3.msra.mxu0 %v1536_v8 }
 0xf69   : > { %3404 = vmatprep.subr.mxu0 %v3672_v1 }
 0xf6a   : > { %3405 = vmatpush3.msra.mxu0 %v1535_v9 }
 0xf6b   : > { %3406 = vmatprep.subr.mxu0 %v3672_v1 }
 0xf6c   : > { %3407 = vmatpush3.msra.mxu0 %v1534_v10 }
 0xf6d   : > { %3408 = vmatprep.subr.mxu0 %v3672_v1 }
 0xf6e   : > { %3409 = vmatpush3.msra.mxu0 %v1533_v11 }
 0xf6f   : > { %3410 = vmatprep.subr.mxu0 %v3672_v1 }
 0xf70   : > { %3411 = vmatpush3.msra.mxu0 %v1532_v12 }
 0xf71   : > { %3412 = vmatprep.subr.mxu0 %v3672_v1 }
 0xf72   : > { %3413 = vmatpush3.msra.mxu0 %v1531_v13 }
 0xf73   : > { %3414 = vmatprep.subr.mxu0 %v3672_v1 }
 0xf74   : > { %3415 = vmatpush3.msra.mxu0 %v1530_v14 }
 0xf75   : > { %3416 = vmatprep.subr.mxu0 %v3672_v1 }
 0xf76   : > { %3417 = vmatpush3.msra.mxu0 %v1529_v29 }
 0xf77   : > { %3418 = vmatprep.subr.mxu0 %v3672_v1 }
 0xf78   : > { %3419 = vmatpush3.msra.mxu0 %v1528_v16 }
 0xf79   : > { %3420 = vmatprep.subr.mxu0 %v3672_v1 }
 0xf7a   : > { %3421 = vmatpush3.msra.mxu0 %v1527_v17 }
 0xf7b   : > { %3422 = vmatprep.subr.mxu0 %v3672_v1 }
 0xf7c   : > { %3423 = vmatpush3.msra.mxu0 %v1526_v18 }
 0xf7d   : > { %3424 = vmatprep.subr.mxu0 %v3672_v1 }
 0xf7e   : > { %3425 = vmatpush3.msra.mxu0 %v1525_v19 }
0x101f   : > { %v2491_v43 = vpop.f32.mrf.mxu0 }
0x1020   : > { %v2492_v44 = vadd.f32 %v2979_v42, %v2491_v43  ;;  %v2699_v42 = vld [vmem:[#allocation2 + $0x158] sm:$0xff] }
0x1021   : > { %v3382_v45 = vpop.f32.mrf.mxu0 }
0x1022   : > { %v2495_v52 = vadd.f32 %v2492_v44, %v3939_v15  ;;  %v1521_v15 = vld [vmem:[#allocation2 + $0x330] sm:$0xff] }
0x1023   : > { %3390 = vmatpush3.msra.mxu1 %v1521_v15 }
0x1024   : > { %v2496_v46 = vsel %vm358_vm2, %v2495_v52, 0.0  ;;  %3429 = vmatprep.subr.mxu1 %v3672_v1 }
0x1025   : > { %2497 = vadd.xlane.f32.xlu0 %v2496_v46  ;;  %v2986_v46 = vld [vmem:[#allocation2 + $0x3d8] ss:$0 sm:$0xff] }
0x10ae   : > { %v2498_v48 = vpop.xlane.xlu0 %2497 }
0x10af   : > { %v2499_v49 = vmul.f32 0.03125, %v2498_v48 }
0x10b1   : > { %v2500_v50 = vsub.f32 %v2495_v52, %v2499_v49  ;;  %v2987_v49 = vld [vmem:[#allocation2 + $0x3d9] ss:$0 sm:$0xff] }
0x10b3   : > { %v2501_v51 = vmul.f32 %v2500_v50, %v2500_v50 }
0x10b5   : > { %v2502_v54 = vsel %vm358_vm2, %v2501_v51, 0.0 }
0x10b6   : > { %2503 = vadd.xlane.f32.xlu1 %v2502_v54 }
0x113f   : > { %v2504_v62 = vpop.xlane.xlu1 %2503 }
0x1140   : > { %v2505_v63 = vmul.f32 0.03125, %v2504_v62 }
0x1142   : > { %v2506_v0 = vadd.f32 1e-05, %v2505_v63 }
0x1144   : > { %3540 = vrsqrt.f32 %v2506_v0 }
0x1151   : > { %v3541_v2 = vpop.eup %3540 }
0x1152   : > { %v2508_v4 = vmul.f32 %v3541_v2, %v2500_v50 }
0x1154   : > { %v2513_v6 = vmul.f32 %v2981_v3, %v2508_v4 }
0x1156   : > { %v2518_v7 = vadd.f32 %v2982_v5, %v2513_v6 }
0x1158   : > { %3392 = vmatmul.mubr.msk.f32.vlgmr.msra.gmra.mxu1 %vm358_vm2, %v2518_v7 }
0x1159   : > { %3437 = vmatprep.mubr.msk.f32.mxu1 %vm3673_vm0, %v3672_v1  ;;  %3430 = vmatpush3.msra.mxu1 %v2702_v39 }
0x115a   : > { %3431 = vmatprep.subr.mxu1 %v3672_v1 }
0x115b   : > { %3432 = vmatpush3.msra.mxu1 %v2701_v40 }
0x115c   : > { %3433 = vmatprep.subr.mxu1 %v3672_v1 }
0x115d   : > { %3434 = vmatpush3.msra.mxu1 %v2700_v41 }
0x115e   : > { %3435 = vmatprep.subr.mxu1 %v3672_v1 }
0x115f   : > { %3436 = vmatpush3.msra.mxu1 %v2699_v42 }
0x1218   : > { %v2592_v21 = vpop.f32.mrf.mxu1 }
0x1219   : > { %v2593_v22 = vadd.f32 %v2983_v20, %v2592_v21 }
0x121a   : > { %v3393_v23 = vpop.f32.mrf.mxu1 }
0x121b   : > { %v2597_v24 = vmul.f32 0.70710677, %v2593_v22  ;;  %v2596_v26 = vmul.f32 0.5, %v2593_v22 }
0x121d   : > { %3542 = verf.f32 %v2597_v24 }
0x122a   : > { %v3543_v25 = vpop.eup %3542 }
0x122b   : > { %v2599_v47 = vadd.f32 1.0, %v3543_v25 }
0x122d   : > { %v2600_v27 = vmul.f32 %v2599_v47, %v2596_v26 }
0x122f   : > { %3427 = vmatmul.mubr.f32.vlgmr.msra.gmra.mxu0 %v2600_v27 }
0x12ef   : > { %v2671_v30 = vpop.f32.mrf.mxu0 }
0x12f0   : > { %v2672_v31 = vadd.f32 %v2985_v28, %v2671_v30 }
0x12f1   : > { %v3428_v32 = vpop.f32.mrf.mxu0 }
0x12f2   : > { %v2675_v53 = vadd.f32 %v2672_v31, %v2518_v7 }
0x12f4   : > { %v2676_v33 = vsel %vm358_vm2, %v2675_v53, 0.0 }
0x12f5   : > { %2677 = vadd.xlane.f32.xlu0 %v2676_v33 }
0x137e   : > { %v2678_v34 = vpop.xlane.xlu0 %2677 }
0x137f   : > { %v2679_v35 = vmul.f32 0.03125, %v2678_v34 }
0x1381   : > { %v2680_v36 = vsub.f32 %v2675_v53, %v2679_v35 }
0x1383   : > { %v2681_v37 = vmul.f32 %v2680_v36, %v2680_v36 }
0x1385   : > { %v2682_v38 = vsel %vm358_vm2, %v2681_v37, 0.0 }
0x1386   : > { %2683 = vadd.xlane.f32.xlu1 %v2682_v38 }
0x140f   : > { %v2684_v43 = vpop.xlane.xlu1 %2683 }
0x1410   : > { %v2685_v44 = vmul.f32 0.03125, %v2684_v43 }
0x1412   : > { %v2686_v45 = vadd.f32 1e-05, %v2685_v44 }
0x1414   : > { %3544 = vrsqrt.f32 %v2686_v45 }
0x1421   : > { %v3545_v52 = vpop.eup %3544 }
0x1422   : > { %v2688_v48 = vmul.f32 %v3545_v52, %v2680_v36 }
0x1424   : > { %v2693_v50 = vmul.f32 %v2986_v46, %v2688_v48 }
0x1426   : > { %v2698_v1 = vadd.f32 %v2987_v49, %v2693_v50 }
0x1428   : > { %3438 = vmatmul.mubr.msk.f32.vlgmr.msra.gmra.mxu1 %vm358_vm2, %v2698_v1  ;;  %v2782_v51 = vsel %vm358_vm2, %v2698_v1, 0.0 }
0x1429   : > { %2783 = vst [vmem:[%s187_s17] sm:$0xff] %v2782_v51 }
0x142a   : > { %3585 = shalt.err (!%p3582_p0)
}
0x142b   : > { %s3586_s5 = scalar_lea.hbm %s2814_s25, 128  ;;  %s3590_s8 = scalar_lea.hbm %s4132_s3, 256 }
0x142c   : > { %p3587_p1 = scmp.ne.s32.totalorder %s2814_s25, %s3586_s5  ;;  %p3591_p4 = scmp.lt.s32.totalorder %s2814_s25, %s4132_s3 }
0x142d   : > { %p3592_p7 = scmp.lt.s32.totalorder %s3590_s8, %s3586_s5 }
0x142e   : > { %p3588_p2 = pnand %p3587_p1, %p3735_p5 }
0x142f   : > { %p3593_p8 = por %p3592_p7, %p3591_p4 }
0x1430   : > { %p3589_p3 = pneg %p3588_p2 }
0x1432   : > { %p3594_p6 = pnand %p3593_p8, %p3589_p3 }
0x1434   : > { %3597 = shalt.err (!%p3594_p6)
}
0x1435   : > { %3445 = dma.vmem_to_hbm [thread:$0]  (%p3735_p5), %s2817_s26, 128, %s2814_s25, %s2790_s27   ;;  %v2988_v54 = vld [vmem:[#allocation2 + $0x178] ss:$0 sm:$0xff] }
0x1436   : > { %s180_s20 = scalar_lea.vmem [#allocation5], %s2925_s11  ;;  %s4093_s30 = scalar_lea.hbm %s4131_s2, %s2992_s19 }
0x1437   : > { %s2803_s24 = sshll.u32 %s180_s20, 4  ;;  %s2785_s4 = scalar_lea.sflag [#allocation4], %s4060_s10  ;;  %s2804_s24 = int_to_ptr.vmem [resolvable:$true] %s2803_s24 }
0x1438   : > { %s3598_s5 = scalar_lea.vmem %s2804_s24, 128  ;;  %s3676_s25 = smov [#allocation5]  }
0x1439   : > { %p3599_p9 = scmp.ne.s32.totalorder %s2804_s24, %s3598_s5  ;;  %s3602_s11 = sshll.u32 %s3676_s25, 4  ;;  %s3603_s11 = int_to_ptr.vmem [resolvable:$false] %s3602_s11 }
0x143a   : > { %s3604_s26 = scalar_lea.vmem %s3603_s11, 256  ;;  %p3605_p12 = scmp.lt.s32.totalorder %s2804_s24, %s3603_s11 }
0x143b   : > { %p3600_p10 = pnand %p3599_p9, %p3735_p5  ;;  %p3606_p13 = scmp.lt.s32.totalorder %s3604_s26, %s3598_s5 }
0x143d   : > { %p3601_p11 = pneg %p3600_p10  ;;  %p3607_p0 = por %p3606_p13, %p3605_p12 }
0x143f   : > { %p3608_p1 = pnand %p3607_p0, %p3601_p11 }
0x14e8   : > { %v2777_v55 = vpop.f32.mrf.mxu1 }
0x14e9   : > { %v2778_v56 = vadd.f32 %v2988_v54, %v2777_v55 }
0x14ea   : > { %v3439_v57 = vpop.f32.mrf.mxu1 }
0x14eb   : > { %2781 = vst [vmem:[%s180_s20] sm:$0xff] %v2778_v56 }
0x14ec   : > { %3611 = shalt.err (!%p3608_p1)
}
0x14ed   : > { %s3612_s16 = scalar_lea.hbm %s4093_s30, 128  ;;  %s3616_s27 = scalar_lea.hbm %s4131_s2, 256 }
0x14ee   : > { %p3613_p2 = scmp.ne.s32.totalorder %s4093_s30, %s3612_s16  ;;  %p3617_p7 = scmp.lt.s32.totalorder %s4093_s30, %s4131_s2 }
0x14ef   : > { %p3618_p8 = scmp.lt.s32.totalorder %s3616_s27, %s3612_s16 }
0x14f0   : > { %p3614_p3 = pnand %p3613_p2, %p3735_p5 }
0x14f1   : > { %p3619_p6 = por %p3618_p8, %p3617_p7 }
0x14f2   : > { %p3615_p4 = pneg %p3614_p3 }
0x14f4   : > { %p3620_p9 = pnand %p3619_p6, %p3615_p4 }
0x14f6   : > { %3623 = shalt.err (!%p3620_p9)
}
0x14f7   : > { %3444 = dma.vmem_to_hbm [thread:$0]  (%p3735_p5), %s2804_s24, 128, %s4093_s30, %s2785_s4  }
0x14f8 PF: > { %p3461_p10 = scmp.ge.s32.totalorder %s3666_s15, 2  ;;  %s2828_s8 = sand.u32 1, %s3654_s12  }
0x14f9   : > { %p4136_p11 = scmp.ne.s32.totalorder %s4134_s23, 0  ;;  %s2829_s9 = scalar_lea.sflag [#allocation4], %s2828_s8 }
0x14fb   : > { %p3453_p12 = pnand %p3461_p10, %p4136_p11 }
0x14fd   : > { %p3454_p13 = pneg %p3453_p12 }
0x14ff   : > { %3645 = dma.done.wait (%p3454_p13), %s2829_s9, 128  }
0x1500   : > { %3647 = vsyncadd (%p3454_p13), %s2829_s9, 4294967168  ;;  %s2838_s17 = scalar_lea.sflag [#allocation7], %s2828_s8 }
0x1501   : > { %3649 = dma.done.wait (%p3454_p13), %s2838_s17, 128  }
0x1502   : > { %3651 = vsyncadd (%p3454_p13), %s2838_s17, 4294967168  ;;  %p18_p5 = scmp.ge.s32.totalorder %s3722_s18, 4   ;;  %s4137_s12 = smov %s3658_s13 }
0x1503   : > { %s4138_s13 = smov %s3662_s14  ;;  %s4139_s14 = smov %s3733_s21 }
0x1504   : > { %s4140_s15 = smov %s3722_s18  ;;  %20 = sbr.rel (!%p18_p5) target bundleno = 6 (0x6), region = 85 }
0x1509   :  { %2843 = vsyncpa [#allocation3], 1 }
0x150a   :  { %2845 = vsyncpa [#allocation3 + $0x1], 1 }
0x150b   :  { %2846 = vsyncpa [#allocation4], 1 }
0x150c   :  { %2848 = vsyncpa [#allocation4 + $0x1], 1 }
0x150d   :  { %2849 = vsyncpa [#allocation7], 1 }
0x150e   :  { %2851 = vsyncpa [#allocation7 + $0x1], 1 }

</bundles_post_ra>
